<compile_context>
chip_gen: v7x
topology: tpu7x:2x2x1
jax: 0.10.0
libtpu: 0.0.40
codegen_flags: <defaults>
</compile_context>

<pallas_src>
import functools
import math

import jax
import jax.numpy as jnp
from jax.experimental import pallas as pl
from jax.experimental.pallas import tpu as pltpu


# ---------------------------------------------------------------------------
# Kernel: one full BertLayer for one (batch, query-tile) grid point.
# ---------------------------------------------------------------------------
def _bert_layer_kernel(
    x_ref,
    wq_ref, bq_ref, wk_ref, bk_ref, wv_ref, bv_ref,
    wo_ref, bo_ref, g1_ref, be1_ref,
    w1_ref, b1_ref, w2_ref, b2_ref, g2_ref, be2_ref,
    o_ref,
    k_scr, v_scr, ctx_scr,
    *, num_heads: int, tq: int,
):
    t = pl.program_id(1)

    # --- K / V projection for the FULL sequence, once per batch element.
    #     (query-tile axis is "arbitrary", so scratch persists across t.)
    @pl.when(t == 0)
    def _():
        xf = x_ref[0].astype(jnp.bfloat16)                             # (S, D)
        k = jnp.dot(xf, wk_ref[...], preferred_element_type=jnp.float32) + bk_ref[...]
        v = jnp.dot(xf, wv_ref[...], preferred_element_type=jnp.float32) + bv_ref[...]
        k_scr[...] = k.astype(jnp.bfloat16)
        v_scr[...] = v.astype(jnp.bfloat16)

    # --- Query tile / residual stream: slice the resident full-sequence block
    #     (no second HBM read of the activations).
    start = pl.multiple_of(t * tq, tq)
    x = x_ref[0, pl.ds(start, tq), :]                                  # (TQ, D) f32
    x_bf = x.astype(jnp.bfloat16)
    D = x.shape[-1]
    dv = D // num_heads
    scale = 1.0 / math.sqrt(dv)

    # --- Q projection for this query tile; fold 1/sqrt(dv) into Q once ---
    q = jnp.dot(x_bf, wq_ref[...], preferred_element_type=jnp.float32) + bq_ref[...]
    q_bf = (q * scale).astype(jnp.bfloat16)

    k_all = k_scr[...]                                                 # (S, D) bf16
    v_all = v_scr[...]                                                 # (S, D) bf16

    # --- per-head attention; heads write in place into ctx scratch (no concat) ---
    for h in range(num_heads):
        lo = h * dv
        qh = q_bf[:, lo:lo + dv]                                       # (TQ, dv)
        kh = k_all[:, lo:lo + dv]                                      # (S, dv)
        vh = v_all[:, lo:lo + dv]                                      # (S, dv)

        # qh @ kh^T without materializing the transpose.
        s = jax.lax.dot_general(qh, kh, (((1,), (1,)), ((), ())),
                                preferred_element_type=jnp.float32)    # (TQ, S) f32
        s = s - jnp.max(s, axis=-1, keepdims=True)
        p = jnp.exp(s)
        p = p * pl.reciprocal(jnp.sum(p, axis=-1, keepdims=True), approx=True)
        ctx_scr[:, lo:lo + dv] = jnp.dot(
            p.astype(jnp.bfloat16), vh, preferred_element_type=jnp.float32)

    # --- BertSelfOutput: dense + LayerNorm (eps=1e-12, one-pass variance) ---
    ctx = ctx_scr[...].astype(jnp.bfloat16)                            # (TQ, D)
    y = jnp.dot(ctx, wo_ref[...], preferred_element_type=jnp.float32) + bo_ref[...]
    mean = jnp.mean(y, axis=-1, keepdims=True)
    var = jnp.maximum(jnp.mean(y * y, axis=-1, keepdims=True) - mean * mean, 0.0)
    y = (y - mean) * jax.lax.rsqrt(var + 1e-12)
    y = y * g1_ref[...] + be1_ref[...]

    # --- BertLayer residual #1: attention(seq) + seq ---
    a = y + x                                                          # (TQ, D) f32

    # --- BertIntermediate: dense(D -> 4D) + GELU ---
    h1 = jnp.dot(a.astype(jnp.bfloat16), w1_ref[...],
                 preferred_element_type=jnp.float32) + b1_ref[...]
    # TODO(synk): nn.GELU() is the exact erf GELU; tanh approximation is used here
    # for guaranteed Mosaic lowering (max abs deviation ~1e-3).
    h1 = jax.nn.gelu(h1, approximate=True)

    # --- BertOutput: dense(4D -> D) + LayerNorm, then residual #2 ---
    h2 = jnp.dot(h1.astype(jnp.bfloat16), w2_ref[...],
                 preferred_element_type=jnp.float32) + b2_ref[...]
    mean2 = jnp.mean(h2, axis=-1, keepdims=True)
    var2 = jnp.maximum(jnp.mean(h2 * h2, axis=-1, keepdims=True) - mean2 * mean2, 0.0)
    h2 = (h2 - mean2) * jax.lax.rsqrt(var2 + 1e-12)
    h2 = h2 * g2_ref[...] + be2_ref[...]

    o_ref[0] = (h2 + a).astype(o_ref.dtype)


# ---------------------------------------------------------------------------
# Wrapper: one pallas_call per BertLayer; Python loop over encoder blocks.
# ---------------------------------------------------------------------------
def _choose_tq(s: int) -> int:
    if s <= 256:
        return s
    for tq in (256, 128, 64, 32, 16, 8):
        if s % tq == 0:
            return tq
    return s


def bert_layer(x, p, *, num_heads: int):
    B, S, D = x.shape
    Dff = p["w1"].shape[1]
    TQ = _choose_tq(S)
    assert S % TQ == 0, "sequence length must be divisible by the query tile"
    nq = S // TQ

    bf = jnp.bfloat16
    args = [
        p["wq"].astype(bf), p["bq"], p["wk"].astype(bf), p["bk"],
        p["wv"].astype(bf), p["bv"], p["wo"].astype(bf), p["bo"],
        p["g1"], p["be1"],
        p["w1"].astype(bf), p["b1"], p["w2"].astype(bf), p["b2"],
        p["g2"], p["be2"],
    ]

    def const(shape):
        zeros = (0,) * len(shape)
        return pl.BlockSpec(shape, lambda b, t: zeros)

    in_specs = [
        pl.BlockSpec((1, S, D), lambda b, t: (b, 0, 0)),    # full sequence (resident per batch)
        const((D, D)), const((1, D)),                        # Wq, bq
        const((D, D)), const((1, D)),                        # Wk, bk
        const((D, D)), const((1, D)),                        # Wv, bv
        const((D, D)), const((1, D)),                        # Wo, bo
        const((1, D)), const((1, D)),                        # gamma1, beta1
        const((D, Dff)), const((1, Dff)),                    # W1, b1
        const((Dff, D)), const((1, D)),                      # W2, b2
        const((1, D)), const((1, D)),                        # gamma2, beta2
    ]

    flops = B * (8 * S * D * D + 4 * S * S * D + 4 * S * D * Dff)
    cost = pl.CostEstimate(
        flops=int(flops),
        transcendentals=int(B * (num_heads * S * S + S * Dff)),
        bytes_accessed=int(2 * (4 * D * D + 2 * D * Dff)        # bf16 weights
                           + 4 * (6 * D + Dff)                   # biases / LN params
                           + 2 * B * S * D * 4),                 # activations in + out
    )

    return pl.pallas_call(
        functools.partial(_bert_layer_kernel, num_heads=num_heads, tq=TQ),
        out_shape=jax.ShapeDtypeStruct((B, S, D), jnp.float32),
        grid_spec=pltpu.PrefetchScalarGridSpec(
            num_scalar_prefetch=0,
            grid=(B, nq),
            in_specs=in_specs,
            out_specs=pl.BlockSpec((1, TQ, D), lambda b, t: (b, t, 0)),
            scratch_shapes=[
                pltpu.VMEM((S, D), jnp.bfloat16),   # K, full sequence, resident per batch
                pltpu.VMEM((S, D), jnp.bfloat16),   # V, full sequence, resident per batch
                pltpu.VMEM((TQ, D), jnp.float32),   # per-head context slab
            ],
        ),
        compiler_params=pltpu.CompilerParams(
            dimension_semantics=("parallel", "arbitrary"),
            vmem_limit_bytes=48 * 1024 * 1024,
        ),
        cost_estimate=cost,
    )(x, *args)


def bert_encoder(x, layer_params, *, num_heads: int):
    for p in layer_params:
        x = bert_layer(x, p, num_heads=num_heads)
    return x


# ---------------------------------------------------------------------------
# Deterministic synthetic parameters (weights stored (D_in, D_out), i.e. already
# transposed relative to torch.nn.Linear.weight).
# ---------------------------------------------------------------------------
def init_layer_params(key, d_model):
    d_ff = 4 * d_model
    ks = jax.random.split(key, 12)
    s = 1.0 / math.sqrt(d_model)
    sf = 1.0 / math.sqrt(d_ff)
    return dict(
        wq=jax.random.normal(ks[0], (d_model, d_model), jnp.float32) * s,
        wk=jax.random.normal(ks[1], (d_model, d_model), jnp.float32) * s,
        wv=jax.random.normal(ks[2], (d_model, d_model), jnp.float32) * s,
        wo=jax.random.normal(ks[3], (d_model, d_model), jnp.float32) * s,
        w1=jax.random.normal(ks[4], (d_model, d_ff), jnp.float32) * s,
        w2=jax.random.normal(ks[5], (d_ff, d_model), jnp.float32) * sf,
        bq=jax.random.normal(ks[6], (1, d_model), jnp.float32) * 0.02,
        bk=jax.random.normal(ks[7], (1, d_model), jnp.float32) * 0.02,
        bv=jax.random.normal(ks[8], (1, d_model), jnp.float32) * 0.02,
        bo=jax.random.normal(ks[9], (1, d_model), jnp.float32) * 0.02,
        b1=jax.random.normal(ks[10], (1, d_ff), jnp.float32) * 0.02,
        b2=jax.random.normal(ks[11], (1, d_model), jnp.float32) * 0.02,
        g1=jnp.ones((1, d_model), jnp.float32),
        be1=jnp.zeros((1, d_model), jnp.float32),
        g2=jnp.ones((1, d_model), jnp.float32),
        be2=jnp.zeros((1, d_model), jnp.float32),
    )


# ---------------------------------------------------------------------------
# Pure-JAX fp32 reference mirroring the PyTorch forward (dropout = identity).
# ---------------------------------------------------------------------------
def reference_bert_layer(x, p, *, num_heads):
    B, S, D = x.shape
    dv = D // num_heads

    def split_heads(t):  # (B,S,D) -> (B,H,S,dv)
        return t.reshape(B, S, num_heads, dv).transpose(0, 2, 1, 3)

    q = split_heads(x @ p["wq"] + p["bq"])
    k = split_heads(x @ p["wk"] + p["bk"])
    v = split_heads(x @ p["wv"] + p["bv"])
    a = jnp.einsum("bhqd,bhkd->bhqk", q, k) / math.sqrt(dv)
    pr = jax.nn.softmax(a, axis=-1)
    ctx = jnp.einsum("bhqk,bhkd->bhqd", pr, v).transpose(0, 2, 1, 3).reshape(B, S, D)

    def layer_norm(y, g, b):
        m = y.mean(-1, keepdims=True)
        vr = ((y - m) ** 2).mean(-1, keepdims=True)
        return (y - m) / jnp.sqrt(vr + 1e-12) * g + b

    attn = layer_norm(ctx @ p["wo"] + p["bo"], p["g1"], p["be1"]) + x      # BertAttention + residual
    h = jax.nn.gelu(attn @ p["w1"] + p["b1"], approximate=False)           # exact GELU (nn.GELU())
    return layer_norm(h @ p["w2"] + p["b2"], p["g2"], p["be2"]) + attn


def reference_bert_encoder(x, params, *, num_heads):
    for p in params:
        x = reference_bert_layer(x, p, num_heads=num_heads)
    return x


if __name__ == "__main__":
    B, S, D, H, L = 2, 8, 32, 4, 2   # batch, seq, d_model, heads, num_encoder_blocks

    key = jax.random.PRNGKey(0)
    k_x, k_p = jax.random.split(key)
    x = jax.random.normal(k_x, (B, S, D), jnp.float32)
    params = [init_layer_params(k, D) for k in jax.random.split(k_p, L)]

    out = bert_encoder(x, params, num_heads=H)
    out = jax.block_until_ready(out)

    ref = reference_bert_encoder(x, params, num_heads=H)
    assert out.shape == (B, S, D)
    assert jnp.allclose(out, ref, atol=5e-2, rtol=5e-2), (
        f"mismatch vs reference: max|diff|={float(jnp.max(jnp.abs(out - ref)))}")

    print("KERNEL_OK")
</pallas_src>

<mosaic_0001>
module attributes {stable_mosaic.version = 11 : i64} {
  func.func @_bert_layer_kernel(%arg0: i32, %arg1: i32, %arg2: memref<1x8x32xf32, #tpu.memory_space<vmem>>, %arg3: memref<32x32xbf16, #tpu.memory_space<vmem>>, %arg4: memref<1x32xf32, #tpu.memory_space<vmem>>, %arg5: memref<32x32xbf16, #tpu.memory_space<vmem>>, %arg6: memref<1x32xf32, #tpu.memory_space<vmem>>, %arg7: memref<32x32xbf16, #tpu.memory_space<vmem>>, %arg8: memref<1x32xf32, #tpu.memory_space<vmem>>, %arg9: memref<32x32xbf16, #tpu.memory_space<vmem>>, %arg10: memref<1x32xf32, #tpu.memory_space<vmem>>, %arg11: memref<1x32xf32, #tpu.memory_space<vmem>>, %arg12: memref<1x32xf32, #tpu.memory_space<vmem>>, %arg13: memref<32x128xbf16, #tpu.memory_space<vmem>>, %arg14: memref<1x128xf32, #tpu.memory_space<vmem>>, %arg15: memref<128x32xbf16, #tpu.memory_space<vmem>>, %arg16: memref<1x32xf32, #tpu.memory_space<vmem>>, %arg17: memref<1x32xf32, #tpu.memory_space<vmem>>, %arg18: memref<1x32xf32, #tpu.memory_space<vmem>>, %arg19: memref<1x8x32xf32, #tpu.memory_space<vmem>>, %arg20: memref<8x32xbf16, #tpu.memory_space<vmem>>, %arg21: memref<8x32xbf16, #tpu.memory_space<vmem>>, %arg22: memref<8x32xf32, #tpu.memory_space<vmem>>) attributes {dimension_semantics = [#tpu.dimension_semantics<parallel>, #tpu.dimension_semantics<arbitrary>], iteration_bounds = array<i64: 2, 1>, scalar_prefetch = 0 : i64, scratch_operands = 3 : i64, tpu.core_type = #tpu.core_type<tc>, window_params = [{transform_indices = @transform_0, window_bounds = array<i64: 1, 8, 32>}, {pipeline_mode = #tpu.pipeline_mode<synchronous>, transform_indices = @transform_1, window_bounds = array<i64: 32, 32>}, {pipeline_mode = #tpu.pipeline_mode<synchronous>, transform_indices = @transform_2, window_bounds = array<i64: 1, 32>}, {pipeline_mode = #tpu.pipeline_mode<synchronous>, transform_indices = @transform_3, window_bounds = array<i64: 32, 32>}, {pipeline_mode = #tpu.pipeline_mode<synchronous>, transform_indices = @transform_4, window_bounds = array<i64: 1, 32>}, {pipeline_mode = #tpu.pipeline_mode<synchronous>, transform_indices = @transform_5, window_bounds = array<i64: 32, 32>}, {pipeline_mode = #tpu.pipeline_mode<synchronous>, transform_indices = @transform_6, window_bounds = array<i64: 1, 32>}, {pipeline_mode = #tpu.pipeline_mode<synchronous>, transform_indices = @transform_7, window_bounds = array<i64: 32, 32>}, {pipeline_mode = #tpu.pipeline_mode<synchronous>, transform_indices = @transform_8, window_bounds = array<i64: 1, 32>}, {pipeline_mode = #tpu.pipeline_mode<synchronous>, transform_indices = @transform_9, window_bounds = array<i64: 1, 32>}, {pipeline_mode = #tpu.pipeline_mode<synchronous>, transform_indices = @transform_10, window_bounds = array<i64: 1, 32>}, {pipeline_mode = #tpu.pipeline_mode<synchronous>, transform_indices = @transform_11, window_bounds = array<i64: 32, 128>}, {pipeline_mode = #tpu.pipeline_mode<synchronous>, transform_indices = @transform_12, window_bounds = array<i64: 1, 128>}, {pipeline_mode = #tpu.pipeline_mode<synchronous>, transform_indices = @transform_13, window_bounds = array<i64: 128, 32>}, {pipeline_mode = #tpu.pipeline_mode<synchronous>, transform_indices = @transform_14, window_bounds = array<i64: 1, 32>}, {pipeline_mode = #tpu.pipeline_mode<synchronous>, transform_indices = @transform_15, window_bounds = array<i64: 1, 32>}, {pipeline_mode = #tpu.pipeline_mode<synchronous>, transform_indices = @transform_16, window_bounds = array<i64: 1, 32>}, {transform_indices = @transform_17, window_bounds = array<i64: 1, 8, 32>}]} {
    %c0_i32 = arith.constant 0 : i32
    %0 = arith.cmpi eq, %arg1, %c0_i32 : i32
    %1 = arith.extui %0 : i1 to i32
    %c0_i32_0 = arith.constant 0 : i32
    %2 = arith.cmpi ne, %1, %c0_i32_0 : i32
    scf.if %2 {
      %c0_76 = arith.constant 0 : index
      %c0_77 = arith.constant 0 : index
      %c0_78 = arith.constant 0 : index
      %176 = vector.load %arg2[%c0_76, %c0_77, %c0_78] : memref<1x8x32xf32, #tpu.memory_space<vmem>>, vector<1x8x32xf32>
      %177 = vector.shape_cast %176 : vector<1x8x32xf32> to vector<8x32xf32>
      %178 = arith.truncf %177 : vector<8x32xf32> to vector<8x32xbf16>
      %c0_79 = arith.constant 0 : index
      %c0_80 = arith.constant 0 : index
      %179 = vector.load %arg5[%c0_79, %c0_80] : memref<32x32xbf16, #tpu.memory_space<vmem>>, vector<32x32xbf16>
      %cst_81 = arith.constant dense<0.000000e+00> : vector<8x32xf32>
      %180 = tpu.matmul %178, %179, %cst_81 {dimension_numbers = #tpu.dot_dimension_numbers<[1], [0], [0], [1], [0, 0, 1, 1], [], []>} : vector<8x32xbf16>, vector<32x32xbf16>, vector<8x32xf32> -> vector<8x32xf32>
      %c0_82 = arith.constant 0 : index
      %c0_83 = arith.constant 0 : index
      %181 = vector.load %arg6[%c0_82, %c0_83] : memref<1x32xf32, #tpu.memory_space<vmem>>, vector<1x32xf32>
      %182 = vector.broadcast %181 : vector<1x32xf32> to vector<8x32xf32>
      %183 = arith.addf %180, %182 : vector<8x32xf32>
      %c0_84 = arith.constant 0 : index
      %c0_85 = arith.constant 0 : index
      %184 = vector.load %arg7[%c0_84, %c0_85] : memref<32x32xbf16, #tpu.memory_space<vmem>>, vector<32x32xbf16>
      %cst_86 = arith.constant dense<0.000000e+00> : vector<8x32xf32>
      %185 = tpu.matmul %178, %184, %cst_86 {dimension_numbers = #tpu.dot_dimension_numbers<[1], [0], [0], [1], [0, 0, 1, 1], [], []>} : vector<8x32xbf16>, vector<32x32xbf16>, vector<8x32xf32> -> vector<8x32xf32>
      %c0_87 = arith.constant 0 : index
      %c0_88 = arith.constant 0 : index
      %186 = vector.load %arg8[%c0_87, %c0_88] : memref<1x32xf32, #tpu.memory_space<vmem>>, vector<1x32xf32>
      %187 = vector.broadcast %186 : vector<1x32xf32> to vector<8x32xf32>
      %188 = arith.addf %185, %187 : vector<8x32xf32>
      %189 = arith.truncf %183 : vector<8x32xf32> to vector<8x32xbf16>
      %c0_89 = arith.constant 0 : index
      %c0_90 = arith.constant 0 : index
      %190 = vector.load %arg20[%c0_89, %c0_90] : memref<8x32xbf16, #tpu.memory_space<vmem>>, vector<8x32xbf16>
      tpu.vector_store %arg20[%c0_89, %c0_90], %189 {strides = array<i32>} : memref<8x32xbf16, #tpu.memory_space<vmem>>, vector<8x32xbf16>,
      %191 = arith.truncf %188 : vector<8x32xf32> to vector<8x32xbf16>
      %c0_91 = arith.constant 0 : index
      %c0_92 = arith.constant 0 : index
      %192 = vector.load %arg21[%c0_91, %c0_92] : memref<8x32xbf16, #tpu.memory_space<vmem>>, vector<8x32xbf16>
      tpu.vector_store %arg21[%c0_91, %c0_92], %191 {strides = array<i32>} : memref<8x32xbf16, #tpu.memory_space<vmem>>, vector<8x32xbf16>,
    } else {
    }
    %c8_i32 = arith.constant 8 : i32
    %3 = arith.muli %arg1, %c8_i32 : i32
    %4 = tpu.assume_multiple %3, 8 : i32
    %c0 = arith.constant 0 : index
    %5 = arith.index_cast %4 : i32 to index
    %c0_1 = arith.constant 0 : index
    %6 = vector.load %arg2[%c0, %5, %c0_1] : memref<1x8x32xf32, #tpu.memory_space<vmem>>, vector<1x8x32xf32>
    %7 = vector.shape_cast %6 : vector<1x8x32xf32> to vector<8x32xf32>
    %8 = arith.truncf %7 : vector<8x32xf32> to vector<8x32xbf16>
    %c0_2 = arith.constant 0 : index
    %c0_3 = arith.constant 0 : index
    %9 = vector.load %arg3[%c0_2, %c0_3] : memref<32x32xbf16, #tpu.memory_space<vmem>>, vector<32x32xbf16>
    %cst = arith.constant dense<0.000000e+00> : vector<8x32xf32>
    %10 = tpu.matmul %8, %9, %cst {dimension_numbers = #tpu.dot_dimension_numbers<[1], [0], [0], [1], [0, 0, 1, 1], [], []>} : vector<8x32xbf16>, vector<32x32xbf16>, vector<8x32xf32> -> vector<8x32xf32>
    %c0_4 = arith.constant 0 : index
    %c0_5 = arith.constant 0 : index
    %11 = vector.load %arg4[%c0_4, %c0_5] : memref<1x32xf32, #tpu.memory_space<vmem>>, vector<1x32xf32>
    %12 = vector.broadcast %11 : vector<1x32xf32> to vector<8x32xf32>
    %13 = arith.addf %10, %12 : vector<8x32xf32>
    %cst_6 = arith.constant 0.353553385 : f32
    %14 = vector.broadcast %cst_6 : f32 to vector<8x32xf32>
    %15 = arith.mulf %13, %14 : vector<8x32xf32>
    %16 = arith.truncf %15 : vector<8x32xf32> to vector<8x32xbf16>
    %c0_7 = arith.constant 0 : index
    %c0_8 = arith.constant 0 : index
    %17 = vector.load %arg20[%c0_7, %c0_8] : memref<8x32xbf16, #tpu.memory_space<vmem>>, vector<8x32xbf16>
    %c0_9 = arith.constant 0 : index
    %c0_10 = arith.constant 0 : index
    %18 = vector.load %arg21[%c0_9, %c0_10] : memref<8x32xbf16, #tpu.memory_space<vmem>>, vector<8x32xbf16>
    %19 = vector.extract_strided_slice %16 {offsets = [0, 0], sizes = [8, 8], strides = [1, 1]} : vector<8x32xbf16> to vector<8x8xbf16>
    %20 = vector.extract_strided_slice %17 {offsets = [0, 0], sizes = [8, 8], strides = [1, 1]} : vector<8x32xbf16> to vector<8x8xbf16>
    %21 = vector.extract_strided_slice %18 {offsets = [0, 0], sizes = [8, 8], strides = [1, 1]} : vector<8x32xbf16> to vector<8x8xbf16>
    %cst_11 = arith.constant dense<0.000000e+00> : vector<8x8xf32>
    %22 = tpu.matmul %19, %20, %cst_11 {dimension_numbers = #tpu.dot_dimension_numbers<[1], [1], [0], [0], [0, 0, 1, 0], [], []>} : vector<8x8xbf16>, vector<8x8xbf16>, vector<8x8xf32> -> vector<8x8xf32>
    %cst_12 = arith.constant dense<0xFF800000> : vector<8xf32>
    %23 = vector.multi_reduction <maximumf>, %22, %cst_12 [1] : vector<8x8xf32> to vector<8xf32>
    %24 = vector.shape_cast %23 : vector<8xf32> to vector<8x1xf32>
    %25 = vector.broadcast %24 : vector<8x1xf32> to vector<8x8xf32>
    %26 = arith.subf %22, %25 : vector<8x8xf32>
    %27 = math.exp %26 : vector<8x8xf32>
    %cst_13 = arith.constant dense<0.000000e+00> : vector<8xf32>
    %28 = vector.multi_reduction <add>, %27, %cst_13 [1] : vector<8x8xf32> to vector<8xf32>
    %29 = vector.shape_cast %28 : vector<8xf32> to vector<8x1xf32>
    %30 = tpu.reciprocal %29 {approx = true} : vector<8x1xf32> -> vector<8x1xf32>
    %31 = vector.broadcast %30 : vector<8x1xf32> to vector<8x8xf32>
    %32 = arith.mulf %27, %31 : vector<8x8xf32>
    %33 = arith.truncf %32 : vector<8x8xf32> to vector<8x8xbf16>
    %cst_14 = arith.constant dense<0.000000e+00> : vector<8x8xf32>
    %34 = tpu.matmul %33, %21, %cst_14 {dimension_numbers = #tpu.dot_dimension_numbers<[1], [0], [0], [1], [0, 0, 1, 1], [], []>} : vector<8x8xbf16>, vector<8x8xbf16>, vector<8x8xf32> -> vector<8x8xf32>
    %c0_15 = arith.constant 0 : index
    %c0_16 = arith.constant 0 : index
    %35 = vector.load %arg22[%c0_15, %c0_16] : memref<8x32xf32, #tpu.memory_space<vmem>>, vector<8x8xf32>
    tpu.vector_store %arg22[%c0_15, %c0_16], %34 {strides = array<i32>} : memref<8x32xf32, #tpu.memory_space<vmem>>, vector<8x8xf32>,
    %36 = vector.extract_strided_slice %16 {offsets = [0, 8], sizes = [8, 8], strides = [1, 1]} : vector<8x32xbf16> to vector<8x8xbf16>
    %37 = vector.extract_strided_slice %17 {offsets = [0, 8], sizes = [8, 8], strides = [1, 1]} : vector<8x32xbf16> to vector<8x8xbf16>
    %38 = vector.extract_strided_slice %18 {offsets = [0, 8], sizes = [8, 8], strides = [1, 1]} : vector<8x32xbf16> to vector<8x8xbf16>
    %cst_17 = arith.constant dense<0.000000e+00> : vector<8x8xf32>
    %39 = tpu.matmul %36, %37, %cst_17 {dimension_numbers = #tpu.dot_dimension_numbers<[1], [1], [0], [0], [0, 0, 1, 0], [], []>} : vector<8x8xbf16>, vector<8x8xbf16>, vector<8x8xf32> -> vector<8x8xf32>
    %cst_18 = arith.constant dense<0xFF800000> : vector<8xf32>
    %40 = vector.multi_reduction <maximumf>, %39, %cst_18 [1] : vector<8x8xf32> to vector<8xf32>
    %41 = vector.shape_cast %40 : vector<8xf32> to vector<8x1xf32>
    %42 = vector.broadcast %41 : vector<8x1xf32> to vector<8x8xf32>
    %43 = arith.subf %39, %42 : vector<8x8xf32>
    %44 = math.exp %43 : vector<8x8xf32>
    %cst_19 = arith.constant dense<0.000000e+00> : vector<8xf32>
    %45 = vector.multi_reduction <add>, %44, %cst_19 [1] : vector<8x8xf32> to vector<8xf32>
    %46 = vector.shape_cast %45 : vector<8xf32> to vector<8x1xf32>
    %47 = tpu.reciprocal %46 {approx = true} : vector<8x1xf32> -> vector<8x1xf32>
    %48 = vector.broadcast %47 : vector<8x1xf32> to vector<8x8xf32>
    %49 = arith.mulf %44, %48 : vector<8x8xf32>
    %50 = arith.truncf %49 : vector<8x8xf32> to vector<8x8xbf16>
    %cst_20 = arith.constant dense<0.000000e+00> : vector<8x8xf32>
    %51 = tpu.matmul %50, %38, %cst_20 {dimension_numbers = #tpu.dot_dimension_numbers<[1], [0], [0], [1], [0, 0, 1, 1], [], []>} : vector<8x8xbf16>, vector<8x8xbf16>, vector<8x8xf32> -> vector<8x8xf32>
    %c0_21 = arith.constant 0 : index
    %c8 = arith.constant 8 : index
    %52 = vector.load %arg22[%c0_21, %c8] : memref<8x32xf32, #tpu.memory_space<vmem>>, vector<8x8xf32>
    tpu.vector_store %arg22[%c0_21, %c8], %51 {strides = array<i32>} : memref<8x32xf32, #tpu.memory_space<vmem>>, vector<8x8xf32>,
    %53 = vector.extract_strided_slice %16 {offsets = [0, 16], sizes = [8, 8], strides = [1, 1]} : vector<8x32xbf16> to vector<8x8xbf16>
    %54 = vector.extract_strided_slice %17 {offsets = [0, 16], sizes = [8, 8], strides = [1, 1]} : vector<8x32xbf16> to vector<8x8xbf16>
    %55 = vector.extract_strided_slice %18 {offsets = [0, 16], sizes = [8, 8], strides = [1, 1]} : vector<8x32xbf16> to vector<8x8xbf16>
    %cst_22 = arith.constant dense<0.000000e+00> : vector<8x8xf32>
    %56 = tpu.matmul %53, %54, %cst_22 {dimension_numbers = #tpu.dot_dimension_numbers<[1], [1], [0], [0], [0, 0, 1, 0], [], []>} : vector<8x8xbf16>, vector<8x8xbf16>, vector<8x8xf32> -> vector<8x8xf32>
    %cst_23 = arith.constant dense<0xFF800000> : vector<8xf32>
    %57 = vector.multi_reduction <maximumf>, %56, %cst_23 [1] : vector<8x8xf32> to vector<8xf32>
    %58 = vector.shape_cast %57 : vector<8xf32> to vector<8x1xf32>
    %59 = vector.broadcast %58 : vector<8x1xf32> to vector<8x8xf32>
    %60 = arith.subf %56, %59 : vector<8x8xf32>
    %61 = math.exp %60 : vector<8x8xf32>
    %cst_24 = arith.constant dense<0.000000e+00> : vector<8xf32>
    %62 = vector.multi_reduction <add>, %61, %cst_24 [1] : vector<8x8xf32> to vector<8xf32>
    %63 = vector.shape_cast %62 : vector<8xf32> to vector<8x1xf32>
    %64 = tpu.reciprocal %63 {approx = true} : vector<8x1xf32> -> vector<8x1xf32>
    %65 = vector.broadcast %64 : vector<8x1xf32> to vector<8x8xf32>
    %66 = arith.mulf %61, %65 : vector<8x8xf32>
    %67 = arith.truncf %66 : vector<8x8xf32> to vector<8x8xbf16>
    %cst_25 = arith.constant dense<0.000000e+00> : vector<8x8xf32>
    %68 = tpu.matmul %67, %55, %cst_25 {dimension_numbers = #tpu.dot_dimension_numbers<[1], [0], [0], [1], [0, 0, 1, 1], [], []>} : vector<8x8xbf16>, vector<8x8xbf16>, vector<8x8xf32> -> vector<8x8xf32>
    %c0_26 = arith.constant 0 : index
    %c16 = arith.constant 16 : index
    %69 = vector.load %arg22[%c0_26, %c16] : memref<8x32xf32, #tpu.memory_space<vmem>>, vector<8x8xf32>
    tpu.vector_store %arg22[%c0_26, %c16], %68 {strides = array<i32>} : memref<8x32xf32, #tpu.memory_space<vmem>>, vector<8x8xf32>,
    %70 = vector.extract_strided_slice %16 {offsets = [0, 24], sizes = [8, 8], strides = [1, 1]} : vector<8x32xbf16> to vector<8x8xbf16>
    %71 = vector.extract_strided_slice %17 {offsets = [0, 24], sizes = [8, 8], strides = [1, 1]} : vector<8x32xbf16> to vector<8x8xbf16>
    %72 = vector.extract_strided_slice %18 {offsets = [0, 24], sizes = [8, 8], strides = [1, 1]} : vector<8x32xbf16> to vector<8x8xbf16>
    %cst_27 = arith.constant dense<0.000000e+00> : vector<8x8xf32>
    %73 = tpu.matmul %70, %71, %cst_27 {dimension_numbers = #tpu.dot_dimension_numbers<[1], [1], [0], [0], [0, 0, 1, 0], [], []>} : vector<8x8xbf16>, vector<8x8xbf16>, vector<8x8xf32> -> vector<8x8xf32>
    %cst_28 = arith.constant dense<0xFF800000> : vector<8xf32>
    %74 = vector.multi_reduction <maximumf>, %73, %cst_28 [1] : vector<8x8xf32> to vector<8xf32>
    %75 = vector.shape_cast %74 : vector<8xf32> to vector<8x1xf32>
    %76 = vector.broadcast %75 : vector<8x1xf32> to vector<8x8xf32>
    %77 = arith.subf %73, %76 : vector<8x8xf32>
    %78 = math.exp %77 : vector<8x8xf32>
    %cst_29 = arith.constant dense<0.000000e+00> : vector<8xf32>
    %79 = vector.multi_reduction <add>, %78, %cst_29 [1] : vector<8x8xf32> to vector<8xf32>
    %80 = vector.shape_cast %79 : vector<8xf32> to vector<8x1xf32>
    %81 = tpu.reciprocal %80 {approx = true} : vector<8x1xf32> -> vector<8x1xf32>
    %82 = vector.broadcast %81 : vector<8x1xf32> to vector<8x8xf32>
    %83 = arith.mulf %78, %82 : vector<8x8xf32>
    %84 = arith.truncf %83 : vector<8x8xf32> to vector<8x8xbf16>
    %cst_30 = arith.constant dense<0.000000e+00> : vector<8x8xf32>
    %85 = tpu.matmul %84, %72, %cst_30 {dimension_numbers = #tpu.dot_dimension_numbers<[1], [0], [0], [1], [0, 0, 1, 1], [], []>} : vector<8x8xbf16>, vector<8x8xbf16>, vector<8x8xf32> -> vector<8x8xf32>
    %c0_31 = arith.constant 0 : index
    %c24 = arith.constant 24 : index
    %86 = vector.load %arg22[%c0_31, %c24] : memref<8x32xf32, #tpu.memory_space<vmem>>, vector<8x8xf32>
    tpu.vector_store %arg22[%c0_31, %c24], %85 {strides = array<i32>} : memref<8x32xf32, #tpu.memory_space<vmem>>, vector<8x8xf32>,
    %c0_32 = arith.constant 0 : index
    %c0_33 = arith.constant 0 : index
    %87 = vector.load %arg22[%c0_32, %c0_33] : memref<8x32xf32, #tpu.memory_space<vmem>>, vector<8x32xf32>
    %88 = arith.truncf %87 : vector<8x32xf32> to vector<8x32xbf16>
    %c0_34 = arith.constant 0 : index
    %c0_35 = arith.constant 0 : index
    %89 = vector.load %arg9[%c0_34, %c0_35] : memref<32x32xbf16, #tpu.memory_space<vmem>>, vector<32x32xbf16>
    %cst_36 = arith.constant dense<0.000000e+00> : vector<8x32xf32>
    %90 = tpu.matmul %88, %89, %cst_36 {dimension_numbers = #tpu.dot_dimension_numbers<[1], [0], [0], [1], [0, 0, 1, 1], [], []>} : vector<8x32xbf16>, vector<32x32xbf16>, vector<8x32xf32> -> vector<8x32xf32>
    %c0_37 = arith.constant 0 : index
    %c0_38 = arith.constant 0 : index
    %91 = vector.load %arg10[%c0_37, %c0_38] : memref<1x32xf32, #tpu.memory_space<vmem>>, vector<1x32xf32>
    %92 = vector.broadcast %91 : vector<1x32xf32> to vector<8x32xf32>
    %93 = arith.addf %90, %92 : vector<8x32xf32>
    %cst_39 = arith.constant dense<0.000000e+00> : vector<8xf32>
    %94 = vector.multi_reduction <add>, %93, %cst_39 [1] : vector<8x32xf32> to vector<8xf32>
    %95 = vector.shape_cast %94 : vector<8xf32> to vector<8x1xf32>
    %cst_40 = arith.constant 3.200000e+01 : f32
    %96 = vector.broadcast %cst_40 : f32 to vector<8x1xf32>
    %97 = arith.divf %95, %96 : vector<8x1xf32>
    %98 = arith.mulf %93, %93 : vector<8x32xf32>
    %cst_41 = arith.constant dense<0.000000e+00> : vector<8xf32>
    %99 = vector.multi_reduction <add>, %98, %cst_41 [1] : vector<8x32xf32> to vector<8xf32>
    %100 = vector.shape_cast %99 : vector<8xf32> to vector<8x1xf32>
    %cst_42 = arith.constant 3.200000e+01 : f32
    %101 = vector.broadcast %cst_42 : f32 to vector<8x1xf32>
    %102 = arith.divf %100, %101 : vector<8x1xf32>
    %103 = arith.mulf %97, %97 : vector<8x1xf32>
    %104 = arith.subf %102, %103 : vector<8x1xf32>
    %cst_43 = arith.constant 0.000000e+00 : f32
    %105 = vector.broadcast %cst_43 : f32 to vector<8x1xf32>
    %106 = arith.maximumf %104, %105 : vector<8x1xf32>
    %107 = vector.broadcast %97 : vector<8x1xf32> to vector<8x32xf32>
    %108 = arith.subf %93, %107 : vector<8x32xf32>
    %cst_44 = arith.constant 9.99999996E-13 : f32
    %109 = vector.broadcast %cst_44 : f32 to vector<8x1xf32>
    %110 = arith.addf %106, %109 : vector<8x1xf32>
    %111 = math.rsqrt %110 : vector<8x1xf32>
    %112 = vector.broadcast %111 : vector<8x1xf32> to vector<8x32xf32>
    %113 = arith.mulf %108, %112 : vector<8x32xf32>
    %c0_45 = arith.constant 0 : index
    %c0_46 = arith.constant 0 : index
    %114 = vector.load %arg11[%c0_45, %c0_46] : memref<1x32xf32, #tpu.memory_space<vmem>>, vector<1x32xf32>
    %115 = vector.broadcast %114 : vector<1x32xf32> to vector<8x32xf32>
    %116 = arith.mulf %113, %115 : vector<8x32xf32>
    %c0_47 = arith.constant 0 : index
    %c0_48 = arith.constant 0 : index
    %117 = vector.load %arg12[%c0_47, %c0_48] : memref<1x32xf32, #tpu.memory_space<vmem>>, vector<1x32xf32>
    %118 = vector.broadcast %117 : vector<1x32xf32> to vector<8x32xf32>
    %119 = arith.addf %116, %118 : vector<8x32xf32>
    %120 = arith.addf %119, %7 : vector<8x32xf32>
    %121 = arith.truncf %120 : vector<8x32xf32> to vector<8x32xbf16>
    %c0_49 = arith.constant 0 : index
    %c0_50 = arith.constant 0 : index
    %122 = vector.load %arg13[%c0_49, %c0_50] : memref<32x128xbf16, #tpu.memory_space<vmem>>, vector<32x128xbf16>
    %cst_51 = arith.constant dense<0.000000e+00> : vector<8x128xf32>
    %123 = tpu.matmul %121, %122, %cst_51 {dimension_numbers = #tpu.dot_dimension_numbers<[1], [0], [0], [1], [0, 0, 1, 1], [], []>} : vector<8x32xbf16>, vector<32x128xbf16>, vector<8x128xf32> -> vector<8x128xf32>
    %c0_52 = arith.constant 0 : index
    %c0_53 = arith.constant 0 : index
    %124 = vector.load %arg14[%c0_52, %c0_53] : memref<1x128xf32, #tpu.memory_space<vmem>>, vector<1x128xf32>
    %125 = vector.broadcast %124 : vector<1x128xf32> to vector<8x128xf32>
    %126 = arith.addf %123, %125 : vector<8x128xf32>
    %127 = arith.mulf %126, %126 : vector<8x128xf32>
    %128 = arith.mulf %126, %127 : vector<8x128xf32>
    %cst_54 = arith.constant 4.471500e-02 : f32
    %129 = vector.broadcast %cst_54 : f32 to vector<8x128xf32>
    %130 = arith.mulf %129, %128 : vector<8x128xf32>
    %131 = arith.addf %126, %130 : vector<8x128xf32>
    %cst_55 = arith.constant 0.797884583 : f32
    %132 = vector.broadcast %cst_55 : f32 to vector<8x128xf32>
    %133 = arith.mulf %132, %131 : vector<8x128xf32>
    %134 = math.tanh %133 : vector<8x128xf32>
    %cst_56 = arith.constant 1.000000e+00 : f32
    %135 = vector.broadcast %cst_56 : f32 to vector<8x128xf32>
    %136 = arith.addf %135, %134 : vector<8x128xf32>
    %cst_57 = arith.constant 5.000000e-01 : f32
    %137 = vector.broadcast %cst_57 : f32 to vector<8x128xf32>
    %138 = arith.mulf %137, %136 : vector<8x128xf32>
    %139 = arith.mulf %126, %138 : vector<8x128xf32>
    %140 = arith.truncf %139 : vector<8x128xf32> to vector<8x128xbf16>
    %c0_58 = arith.constant 0 : index
    %c0_59 = arith.constant 0 : index
    %141 = vector.load %arg15[%c0_58, %c0_59] : memref<128x32xbf16, #tpu.memory_space<vmem>>, vector<128x32xbf16>
    %cst_60 = arith.constant dense<0.000000e+00> : vector<8x32xf32>
    %142 = tpu.matmul %140, %141, %cst_60 {dimension_numbers = #tpu.dot_dimension_numbers<[1], [0], [0], [1], [0, 0, 1, 1], [], []>} : vector<8x128xbf16>, vector<128x32xbf16>, vector<8x32xf32> -> vector<8x32xf32>
    %c0_61 = arith.constant 0 : index
    %c0_62 = arith.constant 0 : index
    %143 = vector.load %arg16[%c0_61, %c0_62] : memref<1x32xf32, #tpu.memory_space<vmem>>, vector<1x32xf32>
    %144 = vector.broadcast %143 : vector<1x32xf32> to vector<8x32xf32>
    %145 = arith.addf %142, %144 : vector<8x32xf32>
    %cst_63 = arith.constant dense<0.000000e+00> : vector<8xf32>
    %146 = vector.multi_reduction <add>, %145, %cst_63 [1] : vector<8x32xf32> to vector<8xf32>
    %147 = vector.shape_cast %146 : vector<8xf32> to vector<8x1xf32>
    %cst_64 = arith.constant 3.200000e+01 : f32
    %148 = vector.broadcast %cst_64 : f32 to vector<8x1xf32>
    %149 = arith.divf %147, %148 : vector<8x1xf32>
    %150 = arith.mulf %145, %145 : vector<8x32xf32>
    %cst_65 = arith.constant dense<0.000000e+00> : vector<8xf32>
    %151 = vector.multi_reduction <add>, %150, %cst_65 [1] : vector<8x32xf32> to vector<8xf32>
    %152 = vector.shape_cast %151 : vector<8xf32> to vector<8x1xf32>
    %cst_66 = arith.constant 3.200000e+01 : f32
    %153 = vector.broadcast %cst_66 : f32 to vector<8x1xf32>
    %154 = arith.divf %152, %153 : vector<8x1xf32>
    %155 = arith.mulf %149, %149 : vector<8x1xf32>
    %156 = arith.subf %154, %155 : vector<8x1xf32>
    %cst_67 = arith.constant 0.000000e+00 : f32
    %157 = vector.broadcast %cst_67 : f32 to vector<8x1xf32>
    %158 = arith.maximumf %156, %157 : vector<8x1xf32>
    %159 = vector.broadcast %149 : vector<8x1xf32> to vector<8x32xf32>
    %160 = arith.subf %145, %159 : vector<8x32xf32>
    %cst_68 = arith.constant 9.99999996E-13 : f32
    %161 = vector.broadcast %cst_68 : f32 to vector<8x1xf32>
    %162 = arith.addf %158, %161 : vector<8x1xf32>
    %163 = math.rsqrt %162 : vector<8x1xf32>
    %164 = vector.broadcast %163 : vector<8x1xf32> to vector<8x32xf32>
    %165 = arith.mulf %160, %164 : vector<8x32xf32>
    %c0_69 = arith.constant 0 : index
    %c0_70 = arith.constant 0 : index
    %166 = vector.load %arg17[%c0_69, %c0_70] : memref<1x32xf32, #tpu.memory_space<vmem>>, vector<1x32xf32>
    %167 = vector.broadcast %166 : vector<1x32xf32> to vector<8x32xf32>
    %168 = arith.mulf %165, %167 : vector<8x32xf32>
    %c0_71 = arith.constant 0 : index
    %c0_72 = arith.constant 0 : index
    %169 = vector.load %arg18[%c0_71, %c0_72] : memref<1x32xf32, #tpu.memory_space<vmem>>, vector<1x32xf32>
    %170 = vector.broadcast %169 : vector<1x32xf32> to vector<8x32xf32>
    %171 = arith.addf %168, %170 : vector<8x32xf32>
    %172 = arith.addf %171, %120 : vector<8x32xf32>
    %c0_73 = arith.constant 0 : index
    %c0_74 = arith.constant 0 : index
    %c0_75 = arith.constant 0 : index
    %173 = vector.load %arg19[%c0_73, %c0_74, %c0_75] : memref<1x8x32xf32, #tpu.memory_space<vmem>>, vector<1x8x32xf32>
    %174 = vector.shape_cast %173 : vector<1x8x32xf32> to vector<8x32xf32>
    %175 = vector.shape_cast %172 : vector<8x32xf32> to vector<1x8x32xf32>
    tpu.vector_store %arg19[%c0_73, %c0_74, %c0_75], %175 {strides = array<i32>} : memref<1x8x32xf32, #tpu.memory_space<vmem>>, vector<1x8x32xf32>,
    return
  }
  func.func @transform_0(%arg0: i32, %arg1: i32) -> (i32, i32, i32) {
    %c0_i32 = arith.constant 0 : i32
    %c0_i32_0 = arith.constant 0 : i32
    %c0_i32_1 = arith.constant 0 : i32
    return %arg0, %c0_i32, %c0_i32_0 : i32, i32, i32
  }
  func.func @transform_1(%arg0: i32, %arg1: i32) -> (i32, i32) {
    %c0_i32 = arith.constant 0 : i32
    %c0_i32_0 = arith.constant 0 : i32
    %c0_i32_1 = arith.constant 0 : i32
    return %c0_i32, %c0_i32_0 : i32, i32
  }
  func.func @transform_2(%arg0: i32, %arg1: i32) -> (i32, i32) {
    %c0_i32 = arith.constant 0 : i32
    %c0_i32_0 = arith.constant 0 : i32
    %c0_i32_1 = arith.constant 0 : i32
    return %c0_i32, %c0_i32_0 : i32, i32
  }
  func.func @transform_3(%arg0: i32, %arg1: i32) -> (i32, i32) {
    %c0_i32 = arith.constant 0 : i32
    %c0_i32_0 = arith.constant 0 : i32
    %c0_i32_1 = arith.constant 0 : i32
    return %c0_i32, %c0_i32_0 : i32, i32
  }
  func.func @transform_4(%arg0: i32, %arg1: i32) -> (i32, i32) {
    %c0_i32 = arith.constant 0 : i32
    %c0_i32_0 = arith.constant 0 : i32
    %c0_i32_1 = arith.constant 0 : i32
    return %c0_i32, %c0_i32_0 : i32, i32
  }
  func.func @transform_5(%arg0: i32, %arg1: i32) -> (i32, i32) {
    %c0_i32 = arith.constant 0 : i32
    %c0_i32_0 = arith.constant 0 : i32
    %c0_i32_1 = arith.constant 0 : i32
    return %c0_i32, %c0_i32_0 : i32, i32
  }
  func.func @transform_6(%arg0: i32, %arg1: i32) -> (i32, i32) {
    %c0_i32 = arith.constant 0 : i32
    %c0_i32_0 = arith.constant 0 : i32
    %c0_i32_1 = arith.constant 0 : i32
    return %c0_i32, %c0_i32_0 : i32, i32
  }
  func.func @transform_7(%arg0: i32, %arg1: i32) -> (i32, i32) {
    %c0_i32 = arith.constant 0 : i32
    %c0_i32_0 = arith.constant 0 : i32
    %c0_i32_1 = arith.constant 0 : i32
    return %c0_i32, %c0_i32_0 : i32, i32
  }
  func.func @transform_8(%arg0: i32, %arg1: i32) -> (i32, i32) {
    %c0_i32 = arith.constant 0 : i32
    %c0_i32_0 = arith.constant 0 : i32
    %c0_i32_1 = arith.constant 0 : i32
    return %c0_i32, %c0_i32_0 : i32, i32
  }
  func.func @transform_9(%arg0: i32, %arg1: i32) -> (i32, i32) {
    %c0_i32 = arith.constant 0 : i32
    %c0_i32_0 = arith.constant 0 : i32
    %c0_i32_1 = arith.constant 0 : i32
    return %c0_i32, %c0_i32_0 : i32, i32
  }
  func.func @transform_10(%arg0: i32, %arg1: i32) -> (i32, i32) {
    %c0_i32 = arith.constant 0 : i32
    %c0_i32_0 = arith.constant 0 : i32
    %c0_i32_1 = arith.constant 0 : i32
    return %c0_i32, %c0_i32_0 : i32, i32
  }
  func.func @transform_11(%arg0: i32, %arg1: i32) -> (i32, i32) {
    %c0_i32 = arith.constant 0 : i32
    %c0_i32_0 = arith.constant 0 : i32
    %c0_i32_1 = arith.constant 0 : i32
    return %c0_i32, %c0_i32_0 : i32, i32
  }
  func.func @transform_12(%arg0: i32, %arg1: i32) -> (i32, i32) {
    %c0_i32 = arith.constant 0 : i32
    %c0_i32_0 = arith.constant 0 : i32
    %c0_i32_1 = arith.constant 0 : i32
    return %c0_i32, %c0_i32_0 : i32, i32
  }
  func.func @transform_13(%arg0: i32, %arg1: i32) -> (i32, i32) {
    %c0_i32 = arith.constant 0 : i32
    %c0_i32_0 = arith.constant 0 : i32
    %c0_i32_1 = arith.constant 0 : i32
    return %c0_i32, %c0_i32_0 : i32, i32
  }
  func.func @transform_14(%arg0: i32, %arg1: i32) -> (i32, i32) {
    %c0_i32 = arith.constant 0 : i32
    %c0_i32_0 = arith.constant 0 : i32
    %c0_i32_1 = arith.constant 0 : i32
    return %c0_i32, %c0_i32_0 : i32, i32
  }
  func.func @transform_15(%arg0: i32, %arg1: i32) -> (i32, i32) {
    %c0_i32 = arith.constant 0 : i32
    %c0_i32_0 = arith.constant 0 : i32
    %c0_i32_1 = arith.constant 0 : i32
    return %c0_i32, %c0_i32_0 : i32, i32
  }
  func.func @transform_16(%arg0: i32, %arg1: i32) -> (i32, i32) {
    %c0_i32 = arith.constant 0 : i32
    %c0_i32_0 = arith.constant 0 : i32
    %c0_i32_1 = arith.constant 0 : i32
    return %c0_i32, %c0_i32_0 : i32, i32
  }
  func.func @transform_17(%arg0: i32, %arg1: i32) -> (i32, i32, i32) {
    %c0_i32 = arith.constant 0 : i32
    %c0_i32_0 = arith.constant 0 : i32
    return %arg0, %arg1, %c0_i32 : i32, i32, i32
  }
}

</mosaic_0001>

<bundles_post_ra>
// kernel: tpu_custom_call.1
= control target key start
LH: loop header
LB: loop body
LE: loop exit
PB: predicated region body
PF: predicated region fallthrough
CT: control target
= control target key end

     0   :  { %s2727_s0 = inlined_call_operand.vmem [shape: f32[2,8,32], index: 0, kind: input, shape index: {}]   ;;  %s2728_s1 = inlined_call_operand.vmem [shape: bf16[32,32], index: 1, kind: input, shape index: {}]   ;;  %s2729_s2 = inlined_call_operand.vmem [shape: f32[1,32], index: 2, kind: input, shape index: {}]   ;;  %s2730_s3 = inlined_call_operand.vmem [shape: bf16[32,32], index: 3, kind: input, shape index: {}]   ;;  %s2731_s4 = inlined_call_operand.vmem [shape: f32[1,32], index: 4, kind: input, shape index: {}]   ;;  %s2732_s5 = inlined_call_operand.vmem [shape: bf16[32,32], index: 5, kind: input, shape index: {}]   ;;  %s2733_s6 = inlined_call_operand.hbm [shape: f32[1,32], index: 6, kind: input, shape index: {}]   ;;  %s2734_s7 = inlined_call_operand.vmem [shape: bf16[32,32], index: 7, kind: input, shape index: {}]   ;;  %s2735_s8 = inlined_call_operand.hbm [shape: f32[1,32], index: 8, kind: input, shape index: {}]   ;;  %s2736_s9 = inlined_call_operand.hbm [shape: f32[1,32], index: 9, kind: input, shape index: {}]   ;;  %s2737_s10 = inlined_call_operand.vmem [shape: f32[1,32], index: 10, kind: input, shape index: {}]   ;;  %s2738_s11 = inlined_call_operand.vmem [shape: bf16[32,128], index: 11, kind: input, shape index: {}]   ;;  %s2739_s12 = inlined_call_operand.vmem [shape: f32[1,128], index: 12, kind: input, shape index: {}]   ;;  %s2740_s13 = inlined_call_operand.vmem [shape: bf16[128,32], index: 13, kind: input, shape index: {}]   ;;  %s2741_s14 = inlined_call_operand.vmem [shape: f32[1,32], index: 14, kind: input, shape index: {}]   ;;  %s2742_s15 = inlined_call_operand.vmem [shape: f32[1,32], index: 15, kind: input, shape index: {}]   ;;  %s2743_s16 = inlined_call_operand.vmem [shape: f32[1,32], index: 16, kind: input, shape index: {}]   ;;  %s2744_s17 = inlined_call_operand.hbm [shape: f32[2,8,32], index: 17, kind: output, shape index: {}]  }
   0x1   :  { %2760 = sst [smem:[#allocation23_spill]] %s2727_s0 }
   0x2   :  { %2761 = sst [smem:[#allocation24_spill]] %s2728_s1 }
   0x3   :  { %2762 = sst [smem:[#allocation25_spill]] %s2735_s8 }
   0x4   :  { %2763 = sst [smem:[#allocation26_spill]] %s2743_s16 }
   0x5   :  { %2764 = sst [smem:[#allocation27_spill]] %s2744_s17 }
   0x6   :  { %22 = vsyncpa [#allocation6], 0 }
   0x7   :  { %23 = vsyncpa [#allocation9], 0 }
   0x8   :  { %24 = vsyncpa [#allocation7], 0 }
   0x9   :  { %26 = vsyncpa [#allocation7 + $0x1], 0  ;;  %s2333_s24 = smov 0   ;;  %s2335_s25 = smov 0  }
   0xa   :  { %s2337_s26 = smov 0   ;;  %s2339_s27 = smov 0  }
   0xb   :  { %s2341_s28 = smov 0   ;;  %s2343_s29 = smov 0  }
   0xc LB: > { %2765 = sst [smem:[#allocation15_spill]] %s2209_s24  ;;  %s1715_s0 = sadd.s32 4294967295, %s2229_s29   ;;  %s2229_s29 = sphi %s2343_s29, %s32_s29   ;;  %s2225_s28 = sphi %s2341_s28, %s2795_s28   ;;  %s2221_s27 = sphi %s2339_s27, %s2794_s27   ;;  %s2217_s26 = sphi %s2337_s26, %s2793_s26   ;;  %s2213_s25 = sphi %s2335_s25, %s2797_s25   ;;  %s2209_s24 = sphi %s2333_s24, %s2796_s24  }
   0xd   : > { %2766 = sst [smem:[#allocation16_spill]] %s2217_s26  ;;  %s1716_s30 = sadd.s32 4294967294, %s2229_s29  }
   0xe   : > { %2767 = sst [smem:[#allocation17_spill]] %s2225_s28  ;;  %s44_s18 = sadd.s32 1, %s2225_s28 }
   0xf   : > { %2768 = sst [smem:[#allocation18_spill]] %s2229_s29  ;;  %s415_s19 = sadd.s32 1, %s2217_s26 }
  0x10   : > { %p46_p0 = scmp.ge.s32.totalorder %s44_s18, 2  ;;  %p425_p1 = scmp.ne.s32.totalorder %s2217_s26, %s2213_s25 }
  0x11   : > { %p426_p2 = scmp.eq.s32.totalorder %s1715_s0, 1  ;;  %p431_p3 = scmp.ne.s32.totalorder %s2213_s25, %s2209_s24 }
  0x12   : > { %s2799_s18 = smov (%p46_p0, %s44_s18), 0  ;;  %p432_p5 = scmp.eq.s32.totalorder %s1716_s30, 1 }
  0x13   : > { %2769 = sst [smem:[#allocation19_spill]] %s2799_s18  ;;  %p2373_p4 = por %p426_p2, %p425_p1 }
  0x14   : > { %s410_s20 = ssub.s32 %s2225_s28, %s2799_s18  ;;  %p1717_p6 = scmp.ge.s32.totalorder %s2229_s29, 1 }
  0x15   : > { %s2770_s1 = scalar_select %p2373_p4, 1, 0 }
  0x16   : > { %p413_p7 = scmp.eq.s32.totalorder %s410_s20, 0  ;;  %p2380_p8 = por %p432_p5, %p431_p3 }
  0x17   : > { %2771 = sst [smem:[#allocation20_spill]] %s2770_s1  ;;  %p439_p9 = scmp.lt.s32.totalorder %s2229_s29, 3 }
  0x18   : > { %s2772_s21 = scalar_select %p2380_p8, 1, 0 }
  0x19   : > { %s2386_s22 = scalar_select %p413_p7, %s2217_s26, %s415_s19  }
  0x1a   : > { %2773 = sst [smem:[#allocation21_spill]] %s2772_s21  ;;  %p2388_p10 = pnand %p1717_p6, %p439_p9 }
  0x1b   : > { %2774 = sst [smem:[#allocation22_spill]] %s2386_s22  ;;  %p2392_p11 = scmp.eq.s32.totalorder %s1715_s0, 0 }
  0x1c   : > { %s2775_s23 = scalar_select %p2388_p10, 1, 0 }
  0x1d   : > { %s2776_s24 = scalar_select %p2392_p11, 1, 0 }
  0x1e   : > { %p1937_p12 = pneg %p2388_p10  ;;  %s2231_s30 = smov [#allocation8]  }
  0x1f   : > { %s481_s20 = sshll.u32 %s2231_s30, 4  ;;  %s2232_s19 = smov [#allocation5]   ;;  %s482_s20 = int_to_ptr.vmem [resolvable:$true] %s481_s20 }
  0x20   : > { %p2400_p13 = pnand %p2392_p11, %p1937_p12  ;;  %s467_s28 = sshll.u32 %s2232_s19, 4  ;;  %s2404_s28 = int_to_ptr.vmem [resolvable:$true] %s467_s28 }
  0x21   : > { %s2778_s8 = sld [smem:[#allocation25_spill]] }
  0x22   : > { %p2414_p1 = pneg %p2400_p13 }
  0x27   : > { %s2059_s26 = scalar_lea.hbm %s2778_s8, 16 }
  0x28   : > { %p2060_p0 = scmp.ne.s32.totalorder %s2778_s8, %s2059_s26  ;;  %p2066_p5 = scmp.lt.u32.totalorder %s2059_s26, %s2778_s8 }
  0x2a   : > { %p2062_p2 = pnand %p2414_p1, %p2060_p0 }
  0x2c   : > { %p2063_p3 = pneg %p2062_p2 }
  0x2e   : > { %p2068_p6 = pnand %p2066_p5, %p2063_p3 }
  0x30   : > { %2071 = shalt.err (!%p2068_p6)
}
  0x31   : > { %s2072_s22 = scalar_lea.vmem %s482_s20, 16  ;;  %s2079_s29 = scalar_lea.vmem %s482_s20, 32 }
  0x32   : > { %p2073_p7 = scmp.ne.s32.totalorder %s482_s20, %s2072_s22  ;;  %p2080_p8 = scmp.lt.s32.totalorder %s482_s20, %s482_s20 }
  0x33   : > { %p2081_p4 = scmp.lt.s32.totalorder %s2079_s29, %s2072_s22 }
  0x34   : > { %p2075_p9 = pnand %p2073_p7, %p2414_p1 }
  0x35   : > { %p2082_p11 = por %p2081_p4, %p2080_p8 }
  0x36   : > { %p2076_p12 = pneg %p2075_p9 }
  0x38   : > { %p2083_p10 = pnand %p2082_p11, %p2076_p12 }
  0x3a   : > { %2086 = shalt.err (!%p2083_p10)
}
  0x3b   : > { %1943 = dma.hbm_to_vmem [thread:$0]  (!%p2400_p13), %s2778_s8, 16, %s482_s20, [#allocation9]  }
  0x3c   : > { %s2087_s19 = scalar_lea.hbm %s2733_s6, 16 }
  0x3d   : > { %p2088_p0 = scmp.ne.s32.totalorder %s2733_s6, %s2087_s19  ;;  %p2094_p8 = scmp.lt.u32.totalorder %s2087_s19, %s2733_s6 }
  0x3f   : > { %p2090_p2 = pnand %p2088_p0, %p2414_p1 }
  0x41   : > { %p2091_p4 = pneg %p2090_p2 }
  0x43   : > { %p2096_p10 = pnand %p2094_p8, %p2091_p4 }
  0x45   : > { %2099 = shalt.err (!%p2096_p10)
}
  0x46   : > { %s2100_s20 = scalar_lea.vmem %s2404_s28, 16  ;;  %s2107_s16 = scalar_lea.vmem %s2404_s28, 32 }
  0x47   : > { %p2101_p11 = scmp.ne.s32.totalorder %s2404_s28, %s2100_s20  ;;  %p2108_p6 = scmp.lt.s32.totalorder %s2404_s28, %s2404_s28 }
  0x48   : > { %p2109_p7 = scmp.lt.s32.totalorder %s2107_s16, %s2100_s20 }
  0x49   : > { %p2103_p3 = pnand %p2101_p11, %p2414_p1 }
  0x4a   : > { %p2110_p9 = por %p2109_p7, %p2108_p6 }
  0x4b   : > { %p2104_p5 = pneg %p2103_p3 }
  0x4d   : > { %p2111_p12 = pnand %p2110_p9, %p2104_p5 }
  0x4f   : > { %2114 = shalt.err (!%p2111_p12)
}
  0x50   : > { %1940 = dma.hbm_to_vmem [thread:$0]  (!%p2400_p13), %s2733_s6, 16, %s2404_s28, [#allocation6]  }
  0x51   : > { %s2233_s0 = smov [#allocation10]   ;;  %s2115_s22 = scalar_lea.hbm %s2736_s9, 16 }
  0x52   : > { %s492_s17 = sshll.u32 %s2233_s0, 4  ;;  %p2116_p0 = scmp.ne.s32.totalorder %s2736_s9, %s2115_s22  ;;  %s493_s17 = int_to_ptr.vmem [resolvable:$true] %s492_s17 }
  0x53   : > { %p2122_p8 = scmp.lt.u32.totalorder %s2115_s22, %s2736_s9 }
  0x54   : > { %p2118_p2 = pnand %p2116_p0, %p2414_p1 }
  0x56   : > { %p2119_p4 = pneg %p2118_p2 }
  0x58   : > { %p2124_p10 = pnand %p2122_p8, %p2119_p4 }
  0x5a   : > { %2127 = shalt.err (!%p2124_p10)
}
  0x5b   : > { %s2128_s28 = scalar_lea.vmem %s493_s17, 16  ;;  %s2135_s1 = scalar_lea.vmem %s493_s17, 32 }
  0x5c   : > { %p2129_p11 = scmp.ne.s32.totalorder %s493_s17, %s2128_s28  ;;  %p2136_p6 = scmp.lt.s32.totalorder %s493_s17, %s493_s17 }
  0x5d   : > { %p2137_p7 = scmp.lt.s32.totalorder %s2135_s1, %s2128_s28 }
  0x5e   : > { %p2131_p3 = pnand %p2129_p11, %p2414_p1 }
  0x5f   : > { %p2138_p9 = por %p2137_p7, %p2136_p6 }
  0x60   : > { %p2132_p5 = pneg %p2131_p3 }
  0x62   : > { %p2139_p12 = pnand %p2138_p9, %p2132_p5 }
  0x64   : > { %2142 = shalt.err (!%p2139_p12)
}
  0x65   : > { %1946 = dma.hbm_to_vmem [thread:$0]  (!%p2400_p13), %s2736_s9, 16, %s493_s17, [#allocation9]  }
  0x66   : > { %p2780_p0 = scmp.ne.s32.totalorder %s2775_s23, 0 }
  0x67   : > { %p2781_p2 = scmp.ne.s32.totalorder (!%p2780_p0), %s2776_s24, 0 }
  0x68   : > { %533 = sbr.rel (%p2780_p0) target bundleno = 2388 (0x954), region = 88 }
  0x6f   : > { %2196 = dma.done.wait (%p2781_p2), [#allocation6], 16  }
  0x70   : > { %2198 = vsyncadd (%p2781_p2), [#allocation6], 4294967280 }
  0x71   : > { %2200 = dma.done.wait (%p2781_p2), [#allocation9], 32  }
  0x72   : > { %2202 = vsyncadd (%p2781_p2), [#allocation9], 4294967264  ;;  %p592_p1 = scmp.lt.s32.totalorder %s2221_s27, 1  ;;  %v2234_v0 = vmov 0.0   ;;  %vm2235_vm0 = vmmov 0   ;;  %s2782_s30 = sld [smem:[#allocation23_spill]] }
  0x73   : > { %1815 = vmatprep.subr.bf16.mxu0 %v2234_v0  ;;  %1819 = vmatprep.mubr.msk.bf16.mxu0 %vm2235_vm0, %v2234_v0  ;;  %v2017_v1 = vld [vmem:[%s2730_s3] sm:$0xff]   ;;  %v2018_v2 = vld [vmem:[%s2730_s3 + $0x8] sm:$0xff]   ;;  %vm626_vm1 = vcmask 261120   ;;  %vm734_vm2 = vcmask 257024   ;;  %v1732_v16 = vld [vmem:[#allocation5] ss:$0 sm:$0xff] }
  0x74   : > { %s593_s8 = scalar_select %p592_p1, %s2221_s27, 1  ;;  %1839 = vmatprep.subr.bf16.mxu1 %v2234_v0  ;;  %1841 = vmatprep.mubr.msk.bf16.mxu1 %vm2235_vm0, %v2234_v0  ;;  %v2019_v5 = vld [vmem:[%s2732_s5] sm:$0xff]   ;;  %v2020_v6 = vld [vmem:[%s2732_s5 + $0x8] sm:$0xff]   ;;  %vm813_vm3 = vcmask 64512   ;;  %vm875_vm4 = vcmask 1043456   ;;  %vm1041_vm5 = vcmask 130112  }
  0x75   : > { %1816 = vmatpush3.bf16.msra.mxu0 %v2017_v1  ;;  %v1728_v9 = vld [vmem:[%s2731_s4] ss:$0 sm:$0xff]  ;;  %s2236_s19 = smov 112   ;;  %s2237_s22 = smov 120   ;;  %vm1157_vm6 = vcmask 195712   ;;  %vm1273_vm7 = vcmask 261312  }
  0x76   : > { %s1727_s18 = sshll.u32 %s593_s8, 3  ;;  %1817 = vmatprep.subr.bf16.mxu0 %v2234_v0  ;;  %s2783_s8 = sld [smem:[#allocation24_spill]]  ;;  %v1736_v26 = vld [vmem:[%s2729_s2] ss:$0 sm:$0xff] }
  0x77   : > { %s2238_s29 = smov 104   ;;  %s2239_s20 = smov 8  }
  0x78   : > { %s595_s17 = scalar_lea.vmem %s2782_s30, %s1727_s18  ;;  %s2240_s0 = smov 16  }
  0x79   : > { %v2499_v3 = vld [vmem:[%s595_s17] sm:$0xff]  ;;  %1818 = vmatpush3.bf16.msra.mxu0 %v2018_v2  ;;  %s2241_s18 = smov 24   ;;  %s589_s1 = sand.u32 1, %s2213_s25  }
  0x7a   : > { %v602_v4 = vpack.c.bf16 %v2499_v3, %v2499_v3  ;;  %1823 = vmatprep.subr.bf16.mxu0 %v2234_v0  ;;  %s1726_s21 = sshll.u32 %s589_s1, 3  ;;  %s2784_s23 = sld [smem:[#allocation20_spill]] }
  0x7b   : > { %s2785_s17 = sld [smem:[#allocation26_spill]]  ;;  %s1772_s26 = sshll.u32 %s2221_s27, 7 }
  0x7c   : > { %1820 = vmatmul.mubr.msk.bf16.vlgmr.msra.gmra.mrb[0].mxu0 %vm626_vm1, %v602_v4  ;;  %v2021_v7 = vld [vmem:[%s2783_s8] sm:$0xff]   ;;  %v2022_v8 = vld [vmem:[%s2783_s8 + $0x8] sm:$0xff]   ;;  %s2786_s16 = sld [smem:[#allocation27_spill]]  ;;  %s2242_s27 = smov [#allocation11]  }
  0x7d   : > { %1824 = vmatpush3.bf16.msra.mxu0 %v2019_v5  ;;  %1827 = vmatprep.mubr.msk.bf16.mxu0 %vm2235_vm0, %v2234_v0 }
  0x7e   : > { %1825 = vmatprep.subr.bf16.mxu0 %v2234_v0 }
  0x80   : > { %p2787_p4 = scmp.ne.s32.totalorder %s2784_s23, 0 }
  0x81   : > { %1826 = vmatpush3.bf16.msra.mxu0 %v2020_v6 }
  0x82   : > { %1831 = vmatprep.subr.bf16.mxu0 %v2234_v0  ;;  %s2679_s28 = scalar_lea.hbm %s2786_s16, %s1772_s26 }
  0x84   : > { %1828 = vmatmul.mubr.msk.bf16.vlgmr.msra.gmra.mrb[4].mxu0 %vm626_vm1, %v602_v4 }
  0x85   : > { %1832 = vmatpush3.bf16.msra.mxu0 %v2021_v7  ;;  %1835 = vmatprep.mubr.msk.bf16.mxu0 %vm2235_vm0, %v2234_v0 }
  0x86   : > { %1833 = vmatprep.subr.bf16.mxu0 %v2234_v0 }
  0x89   : > { %1834 = vmatpush3.bf16.msra.mxu0 %v2022_v8 }
  0x8a   : > { %1845 = vmatprep.subr.bf16.mxu0 %v2234_v0 }
  0x8c   : > { %1836 = vmatmul.mubr.msk.bf16.vlgmr.msra.gmra.mrb[8].mxu0 %vm626_vm1, %v602_v4 }
  0x8d   : > { %1847 = vmatprep.mubr.msk.bf16.mxu0 %vm2235_vm0, %v2234_v0 }
 0x14f   : > { %v664_v10 = vpop.f32.mrb[0].mxu0 }
 0x150   : > { %v665_v11 = vadd.f32 %v1728_v9, %v664_v10  ;;  %v1821_v12 = vpop.f32.mrb[1].mxu0 }
 0x151   : > { %v667_v13 = vpop.f32.mrb[2].mxu0 }
 0x152   : > { %v733_v14 = vpack.c.bf16 %v665_v11, %v665_v11  ;;  %v1822_v15 = vpop.f32.mrb[3].mxu0 }
 0x154   : > { %735 = vst.msk [vmem:[#allocation2] sm:$0xf] %vm734_vm2, %v733_v14 }
 0x157   : > { %v727_v17 = vpop.f32.mrb[4].mxu0 }
 0x158   : > { %v728_v18 = vadd.f32 %v1732_v16, %v727_v17  ;;  %v1829_v19 = vpop.f32.mrb[5].mxu0 }
 0x159   : > { %v730_v20 = vpop.f32.mrb[6].mxu0 }
 0x15a   : > { %v736_v21 = vpack.c.bf16 %v728_v18, %v728_v18  ;;  %v1830_v22 = vpop.f32.mrb[7].mxu0 }
 0x15b   : > { %v811_v23 = vld [vmem:[#allocation2] sm:$0xf] }
 0x15c   : > { %737 = vst.msk [vmem:[#allocation3] sm:$0xf] %vm734_vm2, %v736_v21  ;;  %v818_v24 = vsel %vm813_vm3, %v811_v23, 0  ;;  %v1742_v25 = vcombine.low %v811_v23, %v811_v23 }
 0x15d   : > { %1840 = vmatpush3.bf16.xpose.msra.mxu1 %v818_v24 }
 0x15e   : > { %1045 = vrot.lane.b32.xlu1 %v1742_v25, %s2236_s19  ;;  %926 = vrot.lane.b32.xlu0 %v1742_v25, %s2237_s22 }
 0x15f   : > { %v803_v27 = vpop.f32.mrb[8].mxu0  ;;  %1851 = vmatprep.subr.bf16.mxu1 %v2234_v0 }
 0x160   : > { %v804_v28 = vadd.f32 %v1736_v26, %v803_v27  ;;  %v1837_v29 = vpop.f32.mrb[9].mxu0 }
 0x161   : > { %v806_v30 = vpop.f32.mrb[10].mxu0 }
 0x162   : > { %v809_v31 = vmul.f32 0.35355338, %v804_v28  ;;  %v1838_v32 = vpop.f32.mrb[11].mxu0 }
 0x163   : > { %v2540_v33 = vld [vmem:[#allocation3] sm:$0xf] }
 0x164   : > { %v810_v34 = vpack.c.bf16 %v809_v31, %v809_v31  ;;  %v877_v35 = vsel %vm875_vm4, %v2540_v33, 0  ;;  %v1744_v8 = vcombine.low %v2540_v33, %v2540_v33 }
 0x165   : > { %1846 = vmatpush3.bf16.msra.mxu0 %v877_v35 }
 0x166   : > { %1043 = vrot.lane.b32.xlu1 %v810_v34, %s2236_s19  ;;  %921 = vrot.lane.b32.xlu0 %v810_v34, %s2237_s22 }
 0x167   : > { %1842 = vmatmul.mubr.msk.bf16.vlgmr.msra.gmra.mrb[0].mxu1 %vm813_vm3, %v810_v34  ;;  %1857 = vmatprep.subr.bf16.mxu0 %v2234_v0 }
 0x168   : > { %1853 = vmatprep.mubr.msk.bf16.mxu1 %vm2235_vm0, %v2234_v0 }
 0x16a   : > { %1159 = vrot.lane.b32.xlu1 %v810_v34, %s2238_s29  ;;  %1161 = vrot.lane.b32.xlu0 %v1742_v25, %s2238_s29 }
 0x1d0   : > { %v927_v36 = vpop.permute.xlu0 %926  ;;  %v1046_v38 = vpop.permute.xlu1 %1045 }
 0x1d1   : > { %v932_v37 = vsel %vm813_vm3, %v927_v36, 0  ;;  %v1051_v40 = vsel %vm813_vm3, %v1046_v38, 0 }
 0x1d2   : > { %1852 = vmatpush3.bf16.xpose.msra.mxu1 %v932_v37 }
 0x1d3   : > { %1863 = vmatprep.subr.bf16.mxu1 %v2234_v0 }
 0x1d8   : > { %v922_v39 = vpop.permute.xlu0 %921  ;;  %v1044_v42 = vpop.permute.xlu1 %1043 }
 0x1d9   : > { %1854 = vmatmul.mubr.msk.bf16.vlgmr.msra.gmra.mrb[4].mxu1 %vm813_vm3, %v922_v39 }
 0x1da   : > { %1864 = vmatpush3.bf16.xpose.msra.mxu1 %v1051_v40  ;;  %1865 = vmatprep.mubr.msk.bf16.mxu1 %vm2235_vm0, %v2234_v0 }
 0x1db   : > { %1875 = vmatprep.subr.bf16.mxu1 %v2234_v0 }
 0x1dc   : > { %v1162_v41 = vpop.permute.xlu0 %1161  ;;  %v1160_v44 = vpop.permute.xlu1 %1159 }
 0x1dd   : > { %v1167_v43 = vsel %vm813_vm3, %v1162_v41, 0 }
 0x1e1   : > { %1866 = vmatmul.mubr.msk.bf16.vlgmr.msra.gmra.mrb[8].mxu1 %vm813_vm3, %v1044_v42 }
 0x1e2   : > { %1876 = vmatpush3.bf16.xpose.msra.mxu1 %v1167_v43  ;;  %1877 = vmatprep.mubr.msk.bf16.mxu1 %vm2235_vm0, %v2234_v0 }
 0x1e3   : > { %1887 = vmatprep.subr.bf16.mxu1 %v2234_v0 }
 0x1e9   : > { %1878 = vmatmul.mubr.msk.bf16.vlgmr.msra.gmra.mrb[12].mxu1 %vm813_vm3, %v1160_v44 }
 0x1ea   : > { %1891 = vmatprep.mubr.msk.bf16.mxu1 %vm2235_vm0, %v2234_v0 }
 0x23a   : > { %v854_v45 = vpop.f32.mrb[0].mxu1 }
 0x23b   : > { %v1843_v46 = vpop.f32.mrb[1].mxu1  ;;  %v860_v47 = vsel %vm813_vm3, %v854_v45, -inf }
 0x23c   : > { %861 = vmax.xlane.f32.xlu0 %v860_v47  ;;  %v857_v48 = vpop.f32.mrb[2].mxu1 }
 0x23d   : > { %v1844_v49 = vpop.f32.mrb[3].mxu1 }
 0x2ac   : > { %v968_v50 = vpop.f32.mrb[4].mxu1 }
 0x2ad   : > { %v1855_v51 = vpop.f32.mrb[5].mxu1  ;;  %v974_v52 = vsel %vm813_vm3, %v968_v50, -inf }
 0x2ae   : > { %975 = vmax.xlane.f32.xlu1 %v974_v52  ;;  %v971_v53 = vpop.f32.mrb[6].mxu1 }
 0x2af   : > { %v1856_v54 = vpop.f32.mrb[7].mxu1 }
 0x2b0   : > { %v2025_v54 = vld [vmem:[%s2734_s7] sm:$0xff]  }
 0x2b1   : > { %1888 = vmatpush3.bf16.msra.mxu1 %v2025_v54 }
 0x2b2   : > { %1889 = vmatprep.subr.bf16.mxu1 %v2234_v0 }
 0x2b4   : > { %v1087_v55 = vpop.f32.mrb[8].mxu1 }
 0x2b5   : > { %v1867_v56 = vpop.f32.mrb[9].mxu1  ;;  %v1093_v57 = vsel %vm813_vm3, %v1087_v55, -inf }
 0x2b6   : > { %1094 = vmax.xlane.f32.xlu0 %v1093_v57  ;;  %v1090_v58 = vpop.f32.mrb[10].mxu1 }
 0x2b7   : > { %v1868_v59 = vpop.f32.mrb[11].mxu1 }
 0x2bc   : > { %v1203_v60 = vpop.f32.mrb[12].mxu1 }
 0x2bd   : > { %v1879_v61 = vpop.f32.mrb[13].mxu1  ;;  %v1209_v62 = vsel %vm813_vm3, %v1203_v60, -inf }
 0x2be   : > { %1210 = vmax.xlane.f32.xlu0 %v1209_v62  ;;  %v1206_v63 = vpop.f32.mrb[14].mxu1 }
 0x2bf   : > { %v1880_v1 = vpop.f32.mrb[15].mxu1 }
 0x2c9   : > { %v862_v2 = vpop.xlane.xlu0 %861 }
 0x2ca   : > { %v863_v4 = vsub.f32 %v854_v45, %v862_v2 }
 0x2cc   : > { %v864_v5 = vmul.f32 1.442695, %v863_v4 }
 0x2ce   : > { %2037 = vpow2.f32 %v864_v5 }
 0x2d8   : > { %v2038_v6 = vpop.eup %2037 }
 0x2d9   : > { %v866_v7 = vsel %vm813_vm3, %v2038_v6, 0.0 }
 0x2da   : > { %867 = vadd.xlane.f32.xlu1 %v866_v7  ;;  %v1750_v7 = vld [vmem:[#allocation8] ss:$0 sm:$0xff] }
 0x2eb   : > { %989 = vrot.lane.b32.xlu1 %v1744_v8, %s2237_s22 }
 0x33b   : > { %v976_v9 = vpop.xlane.xlu1 %975 }
 0x33c   : > { %v977_v10 = vsub.f32 %v968_v50, %v976_v9 }
 0x33e   : > { %v978_v11 = vmul.f32 1.442695, %v977_v10 }
 0x340   : > { %2039 = vpow2.f32 %v978_v11 }
 0x343   : > { %v1095_v12 = vpop.xlane.xlu0 %1094 }
 0x344   : > { %v1096_v13 = vsub.f32 %v1087_v55, %v1095_v12  ;;  %v2026_v55 = vld [vmem:[%s2734_s7 + $0x8] sm:$0xff]  }
 0x345   : > { %1890 = vmatpush3.bf16.msra.mxu1 %v2026_v55 }
 0x346   : > { %v1097_v14 = vmul.f32 1.442695, %v1096_v13  ;;  %1903 = vmatprep.subr.bf16.mxu1 %v2234_v0 }
 0x348   : > { %2041 = vpow2.f32 %v1097_v14 }
 0x34a   : > { %v2040_v15 = vpop.eup %2039 }
 0x34b   : > { %v1211_v16 = vpop.xlane.xlu0 %1210  ;;  %v980_v17 = vsel %vm813_vm3, %v2040_v15, 0.0 }
 0x34c   : > { %v1212_v18 = vsub.f32 %v1203_v60, %v1211_v16  ;;  %981 = vadd.xlane.f32.xlu0 %v980_v17  ;;  %v2027_v16 = vld [vmem:[%s2738_s11] sm:$0xff]   ;;  %v2028_v17 = vld [vmem:[%s2738_s11 + $0x8] sm:$0xff]  }
 0x34e   : > { %v1213_v19 = vmul.f32 1.442695, %v1212_v18 }
 0x350   : > { %2043 = vpow2.f32 %v1213_v19 }
 0x352   : > { %v2042_v20 = vpop.eup %2041 }
 0x353   : > { %v1099_v21 = vsel %vm813_vm3, %v2042_v20, 0.0 }
 0x354   : > { %1100 = vadd.xlane.f32.xlu1 %v1099_v21 }
 0x35a   : > { %v2044_v22 = vpop.eup %2043 }
 0x35b   : > { %v1215_v23 = vsel %vm813_vm3, %v2044_v22, 0.0 }
 0x35c   : > { %1216 = vadd.xlane.f32.xlu0 %v1215_v23 }
 0x365   : > { %1221 = vrot.lane.b32.xlu1 %v1744_v8, %s2238_s29 }
 0x367   : > { %v868_v24 = vpop.xlane.xlu1 %867 }
 0x368   : > { %2045 = vrcp.f32 %v868_v24 }
 0x36b   : > { %v990_v27 = vpop.permute.xlu1 %989 }
 0x36c   : > { %v995_v29 = vsel %vm875_vm4, %v990_v27, 0 }
 0x372   : > { %v2046_v25 = vpop.eup %2045  ;;  %1105 = vrot.lane.b32.xlu0 %v1744_v8, %s2236_s19  ;;  %s591_s19 = scalar_lea.vmem [#allocation11], %s1726_s21  ;;  %s2147_s21 = sshll.u32 %s2242_s27, 4  ;;  %s2148_s21 = int_to_ptr.vmem [resolvable:$false] %s2147_s21 }
 0x373   : > { %v870_v26 = vmul.f32 %v2046_v25, %v2038_v6  ;;  %s1614_s22 = sshll.u32 %s591_s19, 4  ;;  %s2149_s24 = scalar_lea.vmem %s2148_s21, 256  ;;  %s2681_s22 = int_to_ptr.vmem [resolvable:$true] %s1614_s22 }
 0x374   : > { %p2150_p11 = scmp.lt.s32.totalorder %s2681_s22, %s2148_s21 }
 0x375   : > { %v871_v28 = vpack.c.bf16 %v870_v26, %v870_v26 }
 0x377   : > { %1848 = vmatmul.mubr.msk.bf16.vlgmr.msra.gmra.mrb[12].mxu0 %vm813_vm3, %v871_v28  ;;  %v1754_v28 = vld [vmem:[#allocation10] ss:$0 sm:$0xff] }
 0x378   : > { %1858 = vmatpush3.bf16.msra.mxu0 %v995_v29  ;;  %1859 = vmatprep.mubr.msk.bf16.mxu0 %vm2235_vm0, %v2234_v0 }
 0x379   : > { %1869 = vmatprep.subr.bf16.mxu0 %v2234_v0 }
 0x3d9   : > { %v982_v30 = vpop.xlane.xlu0 %981 }
 0x3da   : > { %2047 = vrcp.f32 %v982_v30  ;;  %v1755_v30 = vld [vmem:[%s2737_s10] ss:$0 sm:$0xff] }
 0x3e1   : > { %v1101_v31 = vpop.xlane.xlu1 %1100 }
 0x3e2   : > { %2049 = vrcp.f32 %v1101_v31 }
 0x3e4   : > { %v2048_v32 = vpop.eup %2047 }
 0x3e5   : > { %v984_v33 = vmul.f32 %v2048_v32, %v2040_v15  ;;  %v1222_v40 = vpop.permute.xlu1 %1221 }
 0x3e6   : > { %v1227_v42 = vsel %vm875_vm4, %v1222_v40, 0  ;;  %v2035_v40 = vld [vmem:[%s2740_s13 + $0x30] sm:$0xff]  }
 0x3e7   : > { %v985_v34 = vpack.c.bf16 %v984_v33, %v984_v33 }
 0x3e9   : > { %1860 = vmatmul.mubr.msk.bf16.vlgmr.msra.gmra.mrb[16].mxu0 %vm813_vm3, %v985_v34  ;;  %v1217_v35 = vpop.xlane.xlu0 %1216 }
 0x3ea   : > { %2051 = vrcp.f32 %v1217_v35  ;;  %1871 = vmatprep.mubr.msk.bf16.mxu0 %vm2235_vm0, %v2234_v0  ;;  %v2029_v35 = vld [vmem:[%s2740_s13] sm:$0xff]  }
 0x3ec   : > { %v2050_v36 = vpop.eup %2049 }
 0x3ed   : > { %v1103_v37 = vmul.f32 %v2050_v36, %v2042_v20  ;;  %v1106_v38 = vpop.permute.xlu0 %1105  ;;  %v2030_v36 = vld [vmem:[%s2740_s13 + $0x8] sm:$0xff]  }
 0x3ee   : > { %v1111_v39 = vsel %vm875_vm4, %v1106_v38, 0  ;;  %v2033_v38 = vld [vmem:[%s2740_s13 + $0x20] sm:$0xff]  }
 0x3ef   : > { %1870 = vmatpush3.bf16.msra.mxu0 %v1111_v39  ;;  %v1104_v41 = vpack.c.bf16 %v1103_v37, %v1103_v37  ;;  %v2032_v37 = vld [vmem:[%s2740_s13 + $0x18] sm:$0xff]   ;;  %v2034_v39 = vld [vmem:[%s2740_s13 + $0x28] sm:$0xff]  }
 0x3f0   : > { %1881 = vmatprep.subr.bf16.mxu0 %v2234_v0 }
 0x3f2   : > { %1872 = vmatmul.mubr.msk.bf16.vlgmr.msra.gmra.mrb[20].mxu0 %vm813_vm3, %v1104_v41  ;;  %v2036_v41 = vld [vmem:[%s2740_s13 + $0x38] sm:$0xff]  }
 0x3f3   : > { %1882 = vmatpush3.bf16.msra.mxu0 %v1227_v42  ;;  %1883 = vmatprep.mubr.msk.bf16.mxu0 %vm2235_vm0, %v2234_v0  ;;  %v1756_v42 = vld [vmem:[%s2739_s12] ss:$0 sm:$0xff] }
 0x3f4   : > { %v2052_v43 = vpop.eup %2051  ;;  %1895 = vmatprep.subr.bf16.mxu0 %v2234_v0 }
 0x3f5   : > { %v1219_v44 = vmul.f32 %v2052_v43, %v2044_v22 }
 0x3f7   : > { %v1220_v45 = vpack.c.bf16 %v1219_v44, %v1219_v44 }
 0x3fa   : > { %1884 = vmatmul.mubr.msk.bf16.vlgmr.msra.gmra.mrb[24].mxu0 %vm813_vm3, %v1220_v45 }
 0x3fb   : > { %1899 = vmatprep.mubr.msk.bf16.mxu0 %vm2235_vm0, %v2234_v0  ;;  %1896 = vmatpush3.bf16.msra.mxu0 %v2027_v16  ;;  %v1770_v16 = vld [vmem:[%s2785_s17] ss:$0 sm:$0xff] }
 0x3fc   : > { %1897 = vmatprep.subr.bf16.mxu0 %v2234_v0 }
 0x3ff   : > { %1898 = vmatpush3.bf16.msra.mxu0 %v2028_v17 }
 0x44a   : > { %v913_v46 = vpop.f32.mrb[12].mxu0 }
 0x44b   : > { %919 = vst.msk [vmem:[#allocation4] sm:$0xff] %vm813_vm3, %v913_v46  ;;  %v1849_v47 = vpop.f32.mrb[13].mxu0 }
 0x44c   : > { %v916_v48 = vpop.f32.mrb[14].mxu0 }
 0x44d   : > { %v1850_v49 = vpop.f32.mrb[15].mxu0 }
 0x4bc   : > { %v1031_v50 = vpop.f32.mrb[16].mxu0 }
 0x4bd   : > { %1038 = vrot.lane.b32.xlu1 %v1031_v50, %s2239_s20  ;;  %v1861_v51 = vpop.f32.mrb[17].mxu0 }
 0x4be   : > { %v1034_v52 = vpop.f32.mrb[18].mxu0 }
 0x4bf   : > { %v1862_v53 = vpop.f32.mrb[19].mxu0 }
 0x4c5   : > { %v1147_v56 = vpop.f32.mrb[20].mxu0 }
 0x4c6   : > { %1154 = vrot.lane.b32.xlu0 %v1147_v56, %s2240_s0  ;;  %v1873_v57 = vpop.f32.mrb[21].mxu0  ;;  %s1600_s0 = scalar_lea.sflag [#allocation7], %s589_s1 }
 0x4c7   : > { %v1150_v58 = vpop.f32.mrb[22].mxu0  ;;  %v1760_v57 = vld [vmem:[%s2741_s14] ss:$0 sm:$0xff] }
 0x4c8   : > { %v1874_v59 = vpop.f32.mrb[23].mxu0 }
 0x4cd   : > { %v1263_v60 = vpop.f32.mrb[24].mxu0 }
 0x4ce   : > { %1270 = vrot.lane.b32.xlu1 %v1263_v60, %s2241_s18  ;;  %v1885_v61 = vpop.f32.mrb[25].mxu0  ;;  %s2143_s18 = scalar_lea.vmem %s2681_s22, 128 }
 0x4cf   : > { %v1266_v62 = vpop.f32.mrb[26].mxu0  ;;  %p2144_p13 = scmp.ne.s32.totalorder %s2681_s22, %s2143_s18  ;;  %p2151_p3 = scmp.lt.s32.totalorder %s2149_s24, %s2143_s18 }
 0x4d0   : > { %v1886_v63 = vpop.f32.mrb[27].mxu0 }
 0x4d1   : > { %p2145_p8 = pnand %p2144_p13, %p2787_p4  ;;  %p2152_p5 = por %p2151_p3, %p2150_p11 }
 0x4d3   : > { %p2146_p10 = pneg %p2145_p8 }
 0x4d5   : > { %p2153_p6 = pnand %p2152_p5, %p2146_p10 }
 0x52f   : > { %v1039_v1 = vpop.permute.xlu1 %1038 }
 0x530   : > { %1042 = vst.msk [vmem:[#allocation4] sm:$0xff] %vm1041_vm5, %v1039_v1 }
 0x538   : > { %v1155_v2 = vpop.permute.xlu0 %1154 }
 0x539   : > { %1158 = vst.msk [vmem:[#allocation4] sm:$0xff] %vm1157_vm6, %v1155_v2 }
 0x540   : > { %v1271_v4 = vpop.permute.xlu1 %1270 }
 0x541   : > { %1274 = vst.msk [vmem:[#allocation4] sm:$0xff] %vm1273_vm7, %v1271_v4 }
 0x548   : > { %v1275_v5 = vld [vmem:[#allocation4] sm:$0xff] }
 0x549   : > { %v1276_v6 = vpack.c.bf16 %v1275_v5, %v1275_v5 }
 0x54b   : > { %1892 = vmatmul.mubr.msk.bf16.vlgmr.msra.gmra.mrb[16].mxu1 %vm626_vm1, %v1276_v6 }
 0x54c   : > { %1919 = vmatprep.mubr.msk.bf16.mxu1 %vm2235_vm0, %v2234_v0  ;;  %1904 = vmatpush3.bf16.msra.mxu1 %v2029_v35 }
 0x54d   : > { %1905 = vmatprep.subr.bf16.mxu1 %v2234_v0 }
 0x550   : > { %1906 = vmatpush3.bf16.msra.mxu1 %v2030_v36 }
 0x551   : > { %1907 = vmatprep.subr.bf16.mxu1 %v2234_v0 }
 0x61e   : > { %v1337_v8 = vpop.f32.mrb[16].mxu1 }
 0x61f   : > { %v1338_v9 = vadd.f32 %v1750_v7, %v1337_v8  ;;  %v1893_v10 = vpop.f32.mrb[17].mxu1 }
 0x620   : > { %v1340_v11 = vpop.f32.mrb[18].mxu1 }
 0x621   : > { %v1894_v12 = vpop.f32.mrb[19].mxu1  ;;  %v1343_v13 = vsel %vm626_vm1, %v1338_v9, 0.0  ;;  %v1348_v14 = vmul.f32 %v1338_v9, %v1338_v9 }
 0x622   : > { %1344 = vadd.xlane.f32.xlu0 %v1343_v13 }
 0x623   : > { %v1349_v15 = vsel %vm626_vm1, %v1348_v14, 0.0  ;;  %v1769_v14 = vld [vmem:[%s2742_s15] ss:$0 sm:$0xff] }
 0x624   : > { %1350 = vadd.xlane.f32.xlu1 %v1349_v15 }
 0x6af   : > { %v1345_v18 = vpop.xlane.xlu0 %1344 }
 0x6b0   : > { %v1347_v19 = vmul.f32 0.03125, %v1345_v18 }
 0x6b1   : > { %v1351_v20 = vpop.xlane.xlu1 %1350 }
 0x6b2   : > { %v1353_v21 = vmul.f32 %v1347_v19, %v1347_v19  ;;  %v1352_v22 = vmul.f32 0.03125, %v1351_v20  ;;  %v1356_v26 = vsub.f32 %v1338_v9, %v1347_v19 }
 0x6b4   : > { %v1354_v23 = vsub.f32 %v1352_v22, %v1353_v21 }
 0x6b6   : > { %v1355_v24 = vmax.f32 %v1354_v23, 0.0 }
 0x6b8   : > { %v1357_v25 = vadd.f32 1e-12, %v1355_v24 }
 0x6ba   : > { %2053 = vrsqrt.f32 %v1357_v25 }
 0x6c4   : > { %v2054_v27 = vpop.eup %2053 }
 0x6c5   : > { %v1359_v29 = vmul.f32 %v2054_v27, %v1356_v26 }
 0x6c7   : > { %v1367_v31 = vmul.f32 %v1754_v28, %v1359_v29 }
 0x6c9   : > { %v1375_v32 = vadd.f32 %v1755_v30, %v1367_v31 }
 0x6cb   : > { %v2623_v33 = vadd.f32 %v1375_v32, %v2499_v3  ;;  %v2031_v3 = vld [vmem:[%s2740_s13 + $0x10] sm:$0xff]  }
 0x6cc   : > { %1908 = vmatpush3.bf16.msra.mxu1 %v2031_v3 }
 0x6cd   : > { %v1377_v34 = vpack.c.bf16 %v2623_v33, %v2623_v33  ;;  %1909 = vmatprep.subr.bf16.mxu1 %v2234_v0 }
 0x6cf   : > { %1900 = vmatmul.mubr.msk.bf16.vlgmr.msra.gmra.mrb[28].mxu0 %vm626_vm1, %v1377_v34 }
 0x6d0   : > { %1910 = vmatpush3.bf16.msra.mxu1 %v2032_v37 }
 0x6d1   : > { %1911 = vmatprep.subr.bf16.mxu1 %v2234_v0 }
 0x6d4   : > { %1912 = vmatpush3.bf16.msra.mxu1 %v2033_v38 }
 0x6d5   : > { %1913 = vmatprep.subr.bf16.mxu1 %v2234_v0 }
 0x6d8   : > { %1914 = vmatpush3.bf16.msra.mxu1 %v2034_v39 }
 0x6d9   : > { %1915 = vmatprep.subr.bf16.mxu1 %v2234_v0 }
 0x6dc   : > { %1916 = vmatpush3.bf16.msra.mxu1 %v2035_v40 }
 0x6dd   : > { %1917 = vmatprep.subr.bf16.mxu1 %v2234_v0 }
 0x6e0   : > { %1918 = vmatpush3.bf16.msra.mxu1 %v2036_v41 }
 0x7a2   : > { %v1438_v43 = vpop.f32.mrb[28].mxu0 }
 0x7a3   : > { %v1439_v44 = vadd.f32 %v1756_v42, %v1438_v43  ;;  %v1901_v45 = vpop.f32.mrb[29].mxu0 }
 0x7a4   : > { %v1441_v46 = vpop.f32.mrb[30].mxu0 }
 0x7a5   : > { %v1444_v47 = vmul.f32 %v1439_v44, %v1439_v44  ;;  %v1902_v48 = vpop.f32.mrb[31].mxu0 }
 0x7a7   : > { %v1445_v49 = vmul.f32 %v1444_v47, %v1439_v44 }
 0x7a9   : > { %v1446_v50 = vmul.f32 0.044715, %v1445_v49 }
 0x7ab   : > { %v1447_v51 = vadd.f32 %v1446_v50, %v1439_v44 }
 0x7ad   : > { %v1448_v52 = vmul.f32 0.7978846, %v1447_v51 }
 0x7af   : > { %2055 = vtanh.f32 %v1448_v52 }
 0x7b9   : > { %v2056_v53 = vpop.eup %2055 }
 0x7ba   : > { %v1450_v54 = vadd.f32 1.0, %v2056_v53 }
 0x7bc   : > { %v1451_v55 = vmul.f32 0.5, %v1450_v54 }
 0x7be   : > { %v1452_v0 = vmul.f32 %v1451_v55, %v1439_v44 }
 0x7c0   : > { %v1453_v56 = vpack.c.bf16 %v1452_v0, %v1452_v0 }
 0x7c2   : > { %1920 = vmatmul.mubr.bf16.vlgmr.msra.gmra.mrb[20].mxu1 %v1453_v56 }
 0x895   : > { %v1559_v58 = vpop.f32.mrb[20].mxu1 }
 0x896   : > { %v1560_v59 = vadd.f32 %v1760_v57, %v1559_v58  ;;  %v1921_v60 = vpop.f32.mrb[21].mxu1 }
 0x897   : > { %v1562_v61 = vpop.f32.mrb[22].mxu1 }
 0x898   : > { %v1922_v62 = vpop.f32.mrb[23].mxu1  ;;  %v1565_v63 = vsel %vm626_vm1, %v1560_v59, 0.0  ;;  %v1569_v1 = vmul.f32 %v1560_v59, %v1560_v59 }
 0x899   : > { %1566 = vadd.xlane.f32.xlu0 %v1565_v63 }
 0x89a   : > { %v1570_v2 = vsel %vm626_vm1, %v1569_v1, 0.0 }
 0x89d   : > { %1571 = vadd.xlane.f32.xlu0 %v1570_v2 }
 0x926   : > { %v1567_v4 = vpop.xlane.xlu0 %1566 }
 0x927   : > { %v1568_v5 = vmul.f32 0.03125, %v1567_v4 }
 0x929   : > { %v1574_v7 = vmul.f32 %v1568_v5, %v1568_v5  ;;  %v1577_v12 = vsub.f32 %v1560_v59, %v1568_v5 }
 0x92a   : > { %v1572_v6 = vpop.xlane.xlu0 %1571 }
 0x92b   : > { %v1573_v8 = vmul.f32 0.03125, %v1572_v6 }
 0x92d   : > { %v1575_v9 = vsub.f32 %v1573_v8, %v1574_v7 }
 0x92f   : > { %v1576_v10 = vmax.f32 %v1575_v9, 0.0 }
 0x931   : > { %v1578_v11 = vadd.f32 1e-12, %v1576_v10 }
 0x933   : > { %2057 = vrsqrt.f32 %v1578_v11 }
 0x93d   : > { %v2058_v13 = vpop.eup %2057 }
 0x93e   : > { %v1580_v15 = vmul.f32 %v2058_v13, %v1577_v12 }
 0x940   : > { %v1588_v17 = vmul.f32 %v1769_v14, %v1580_v15 }
 0x942   : > { %v1596_v18 = vadd.f32 %v1770_v16, %v1588_v17 }
 0x944   : > { %v1597_v19 = vadd.f32 %v1596_v18, %v2623_v33 }
 0x946   : > { %1598 = vst.msk [vmem:[%s591_s19] sm:$0xff] %vm626_vm1, %v1597_v19 }
 0x947   : > { %2156 = shalt.err (!%p2153_p6)
}
 0x948   : > { %s2157_s1 = scalar_lea.hbm %s2679_s28, 128  ;;  %s2161_s26 = scalar_lea.hbm %s2786_s16, 256 }
 0x949   : > { %p2158_p7 = scmp.ne.s32.totalorder %s2679_s28, %s2157_s1  ;;  %p2162_p0 = scmp.lt.u32.totalorder %s2679_s28, %s2786_s16 }
 0x94a   : > { %p2163_p2 = scmp.lt.u32.totalorder %s2161_s26, %s2157_s1  ;;  %p2165_p13 = scmp.lt.u32.totalorder %s2157_s1, %s2679_s28 }
 0x94b   : > { %p2159_p9 = pnand %p2158_p7, %p2787_p4 }
 0x94c   : > { %p2164_p1 = por %p2163_p2, %p2162_p0 }
 0x94d   : > { %p2160_p12 = pneg %p2159_p9 }
 0x94e   : > { %p2166_p8 = por %p2165_p13, %p2164_p1 }
 0x950   : > { %p2167_p10 = pnand %p2166_p8, %p2160_p12 }
 0x952   : > { %2170 = shalt.err (!%p2167_p10)
}
 0x953   : > { %1935 = dma.vmem_to_hbm [thread:$0]  (%p2787_p4), %s2681_s22, 128, %s2679_s28, %s1600_s0  }
 0x954 PF: > { %s2788_s20 = sld [smem:[#allocation18_spill]]  ;;  %s2789_s18 = sld [smem:[#allocation15_spill]] }
 0x955   : > { %s2790_s27 = sld [smem:[#allocation21_spill]] }
 0x95a   : > { %p1957_p11 = scmp.ge.s32.totalorder %s2788_s20, 2  ;;  %s1626_s21 = sand.u32 1, %s2789_s18  }
 0x95b   : > { %p2791_p3 = scmp.ne.s32.totalorder %s2790_s27, 0  ;;  %s1627_s24 = scalar_lea.sflag [#allocation7], %s1626_s21 }
 0x95d   : > { %p1948_p5 = pnand %p1957_p11, %p2791_p3 }
 0x95f   : > { %2204 = dma.done.wait (!%p1948_p5), %s1627_s24, 128  }
 0x960   : > { %2206 = vsyncadd (!%p1948_p5), %s1627_s24, 4294967168  ;;  %s32_s29 = sadd.s32 1, %s2788_s20   ;;  %s2792_s1 = sld [smem:[#allocation16_spill]] }
 0x961   : > { %p29_p6 = scmp.ge.s32.totalorder %s32_s29, 4   ;;  %s2793_s26 = sld [smem:[#allocation22_spill]] }
 0x962   : > { %s2794_s27 = sld [smem:[#allocation17_spill]]  ;;  %s2795_s28 = sld [smem:[#allocation19_spill]] }
 0x963   : > { %s2796_s24 = smov %s2213_s25  ;;  %31 = sbr.rel (!%p29_p6) target bundleno = 12 (0xc), region = 141 }
 0x966   : > { %s2797_s25 = smov %s2792_s1 }
 0x96a   :  { %1632 = vsyncpa [#allocation6], 1 }
 0x96b   :  { %1634 = vsyncpa [#allocation6 + $0x1], 1 }
 0x96c   :  { %1635 = vsyncpa [#allocation9], 1 }
 0x96d   :  { %1636 = vsyncpa [#allocation7], 1 }
 0x96e   :  { %1638 = vsyncpa [#allocation7 + $0x1], 1 }

</bundles_post_ra>
